<compile_context>
chip_gen: v6e
topology: v6e:2x2x1
jax: 0.10.0
libtpu: 0.0.40
codegen_flags: <defaults>
</compile_context>

<pallas_src>
import functools

import jax
import jax.numpy as jnp
from jax import lax
from jax.experimental import pallas as pl
from jax.experimental.pallas import tpu as pltpu

IM_DIM = 42
HIDDEN = 128
DIMS = [IM_DIM, HIDDEN * 4, HIDDEN * 2, HIDDEN, 1]   # 42 -> 512 -> 256 -> 128 -> 1


def _leaky_relu(v, slope=0.2):
    # For 0 < slope < 1, max(v, slope*v) == LeakyReLU(slope): 2 VALU ops
    # (mul + max) instead of 3 (cmp + mul + select).
    return jnp.maximum(v, slope * v)


def disc_kernel(x_ref,
                w1_ref, b1_ref,
                w2_ref, b2_ref,
                w3_ref, b3_ref,
                w4_ref, b4_ref,
                o_ref, *, act_dtype):
    """Fused 4-layer MLP forward for one batch tile.

    x_ref : (T, 42)   f32   natural layout; transposed inside the MXU contraction
    w1_ref: (512, 42) bf16
    w2_ref: (256, 512) bf16
    w3_ref: (128, 256) bf16
    bN_ref: (out, 1)  act_dtype (bf16 on v6e/v7x, f32 on v5e)
    w4_ref: (128, 1)  f32, b4_ref: (1, 1) f32
    o_ref : (1, T)    f32   lane-dense logits
    """
    x = x_ref[...].astype(jnp.bfloat16)                           # (T, 42)

    # Layer 1: w1 (512,42) . x^T (42,T) -> (512,T); the rhs transpose is
    # handled by Mosaic (XLU) under the MXU work.
    h = lax.dot_general(w1_ref[...], x, (((1,), (1,)), ((), ())),
                        preferred_element_type=jnp.float32)       # (512, T) f32
    h = _leaky_relu(h.astype(act_dtype) + b1_ref[...])            # (512, T)

    h = jnp.dot(w2_ref[...], h.astype(jnp.bfloat16),
                preferred_element_type=jnp.float32)               # (256, T) f32
    h = _leaky_relu(h.astype(act_dtype) + b2_ref[...])            # (256, T)

    h = jnp.dot(w3_ref[...], h.astype(jnp.bfloat16),
                preferred_element_type=jnp.float32)               # (128, T) f32
    h = _leaky_relu(h.astype(act_dtype) + b3_ref[...])            # (128, T)

    # Final 128 -> 1 layer on the VPU/XLU: elementwise mul by the (128, 1)
    # weight column + sublane reduction in f32.  Keeps the MXU free and
    # produces a lane-dense (1, T) result for a full unmasked store.
    logits = jnp.sum(h.astype(jnp.float32) * w4_ref[...], axis=0,
                     keepdims=True) + b4_ref[...]
    o_ref[...] = logits.astype(o_ref.dtype)


def _chip_traits():
    """(has packed-bf16 VPU, has 2 TensorCores per device)."""
    kind = ""
    try:
        kind = jax.devices()[0].device_kind.lower()
    except Exception:
        pass
    bf16_vpu = ("v6" in kind) or ("v7" in kind)
    two_tc = ("v7" in kind) or ("v4" in kind) or ("v5p" in kind)
    return bf16_vpu, two_tc


@functools.partial(jax.jit, static_argnames=("batch_tile",))
def discriminator_forward(x, params, batch_tile=512):
    """x: (B, 42) float32 -> (B, 1) float32.

    params: list of (w, b) in PyTorch layout, w: (out, in) f32, b: (out,) f32.
    """
    B, F = x.shape
    assert F == IM_DIM

    bf16_vpu, two_tc = _chip_traits()
    act_dtype = jnp.bfloat16 if bf16_vpu else jnp.float32

    # --- batch tile selection (all static at trace time) ---------------------
    tile = int(batch_tile)
    assert tile % 128 == 0, "batch_tile must be a multiple of 128"
    if B <= 128:
        tile = 128                                    # tiny batch: minimal padding
    else:
        tile = min(tile, ((B + 127) // 128) * 128)    # don't over-pad small B
        if two_tc and B > 256:
            # Ensure >= 2 grid steps so both TensorCores get work (v7x/v4/v5p).
            half = ((-(-B // 2)) + 127) // 128 * 128
            tile = min(tile, half)
    num_tiles = -(-B // tile)
    Bp = num_tiles * tile

    xp = x if Bp == B else jnp.pad(x, ((0, Bp - B), (0, 0)))

    # --- parameters: matmul weights in bf16, biases in the epilogue dtype ----
    (w1, b1), (w2, b2), (w3, b3), (w4, b4) = params
    w1b = w1.astype(jnp.bfloat16)                      # (512, 42)
    w2b = w2.astype(jnp.bfloat16)                      # (256, 512)
    w3b = w3.astype(jnp.bfloat16)                      # (128, 256)
    w4c = w4.reshape(HIDDEN, 1).astype(jnp.float32)    # (128, 1)
    b1c = b1.reshape(-1, 1).astype(act_dtype)
    b2c = b2.reshape(-1, 1).astype(act_dtype)
    b3c = b3.reshape(-1, 1).astype(act_dtype)
    b4c = b4.reshape(1, 1).astype(jnp.float32)

    def resident(arr):
        # Grid-invariant block (constant index_map) -> stays resident in VMEM
        # across the whole grid (< 1 MiB total).
        shape = arr.shape
        return pl.BlockSpec(shape, lambda i, _n=len(shape): (0,) * _n)

    out = pl.pallas_call(
        functools.partial(disc_kernel, act_dtype=act_dtype),
        out_shape=jax.ShapeDtypeStruct((1, Bp), jnp.float32),
        grid_spec=pltpu.PrefetchScalarGridSpec(
            num_scalar_prefetch=0,
            grid=(num_tiles,),
            in_specs=[
                pl.BlockSpec((tile, IM_DIM), lambda i: (i, 0)),   # x tile (natural layout)
                resident(w1b), resident(b1c),
                resident(w2b), resident(b2c),
                resident(w3b), resident(b3c),
                resident(w4c), resident(b4c),
            ],
            out_specs=pl.BlockSpec((1, tile), lambda i: (0, i)),   # lane-dense output
        ),
        compiler_params=pltpu.CompilerParams(
            dimension_semantics=("parallel",)),
    )(xp, w1b, b1c, w2b, b2c, w3b, b3c, w4c, b4c)

    return out[0, :B].reshape(B, 1)


def init_params(key):
    """PyTorch nn.Linear default init: U(-1/sqrt(fan_in), +1/sqrt(fan_in))."""
    params = []
    for li in range(4):
        fan_in, fan_out = DIMS[li], DIMS[li + 1]
        key, kw, kb = jax.random.split(key, 3)
        bound = 1.0 / jnp.sqrt(jnp.float32(fan_in))
        w = jax.random.uniform(kw, (fan_out, fan_in), jnp.float32, -bound, bound)
        b = jax.random.uniform(kb, (fan_out,), jnp.float32, -bound, bound)
        params.append((w, b))
    return params


def reference_forward(x, params):
    """Pure-JAX f32 reference matching the PyTorch module."""
    h = x
    for li, (w, b) in enumerate(params):
        h = h @ w.T + b
        if li < 3:
            h = jnp.where(h > 0, h, 0.2 * h)
    return h


if __name__ == "__main__":
    key = jax.random.PRNGKey(0)
    k_x, k_p, k_x2 = jax.random.split(key, 3)

    params = init_params(k_p)

    # Small batch (single 128-wide tile).
    batch = 8
    x = jax.random.normal(k_x, (batch, IM_DIM), jnp.float32)
    out = jax.block_until_ready(discriminator_forward(x, params))
    ref = reference_forward(x, params)
    assert out.shape == (batch, 1), out.shape
    # bf16 matmul inputs (f32 accumulation) vs f32 reference -> loosened tolerance.
    assert jnp.allclose(out, ref, atol=5e-2, rtol=5e-2), \
        f"max abs err {jnp.max(jnp.abs(out - ref))}"

    # Batch with a remainder (exercises batch padding / multi-tile path).
    batch2 = 300
    x2 = jax.random.normal(k_x2, (batch2, IM_DIM), jnp.float32)
    out2 = jax.block_until_ready(discriminator_forward(x2, params))
    ref2 = reference_forward(x2, params)
    assert out2.shape == (batch2, 1), out2.shape
    assert jnp.allclose(out2, ref2, atol=5e-2, rtol=5e-2), \
        f"max abs err {jnp.max(jnp.abs(out2 - ref2))}"

    print("KERNEL_OK")
</pallas_src>

<mosaic_0001>
module attributes {stable_mosaic.version = 11 : i64} {
  func.func @disc_kernel(%arg0: i32, %arg1: memref<128x42xf32, #tpu.memory_space<vmem>>, %arg2: memref<512x42xbf16, #tpu.memory_space<vmem>>, %arg3: memref<512x1xf32, #tpu.memory_space<vmem>>, %arg4: memref<256x512xbf16, #tpu.memory_space<vmem>>, %arg5: memref<256x1xf32, #tpu.memory_space<vmem>>, %arg6: memref<128x256xbf16, #tpu.memory_space<vmem>>, %arg7: memref<128x1xf32, #tpu.memory_space<vmem>>, %arg8: memref<128x1xf32, #tpu.memory_space<vmem>>, %arg9: memref<1x1xf32, #tpu.memory_space<vmem>>, %arg10: memref<1x128xf32, #tpu.memory_space<vmem>>) attributes {dimension_semantics = [#tpu.dimension_semantics<parallel>], iteration_bounds = array<i64: 1>, scalar_prefetch = 0 : i64, scratch_operands = 0 : i64, tpu.core_type = #tpu.core_type<tc>, window_params = [{transform_indices = @transform_0, window_bounds = array<i64: 128, 42>}, {pipeline_mode = #tpu.pipeline_mode<synchronous>, transform_indices = @transform_1, window_bounds = array<i64: 512, 42>}, {pipeline_mode = #tpu.pipeline_mode<synchronous>, transform_indices = @transform_2, window_bounds = array<i64: 512, 1>}, {pipeline_mode = #tpu.pipeline_mode<synchronous>, transform_indices = @transform_3, window_bounds = array<i64: 256, 512>}, {pipeline_mode = #tpu.pipeline_mode<synchronous>, transform_indices = @transform_4, window_bounds = array<i64: 256, 1>}, {pipeline_mode = #tpu.pipeline_mode<synchronous>, transform_indices = @transform_5, window_bounds = array<i64: 128, 256>}, {pipeline_mode = #tpu.pipeline_mode<synchronous>, transform_indices = @transform_6, window_bounds = array<i64: 128, 1>}, {pipeline_mode = #tpu.pipeline_mode<synchronous>, transform_indices = @transform_7, window_bounds = array<i64: 128, 1>}, {pipeline_mode = #tpu.pipeline_mode<synchronous>, transform_indices = @transform_8, window_bounds = array<i64: 1, 1>}, {transform_indices = @transform_9, window_bounds = array<i64: 1, 128>}]} {
    %c0 = arith.constant 0 : index
    %c0_0 = arith.constant 0 : index
    %0 = vector.load %arg1[%c0, %c0_0] : memref<128x42xf32, #tpu.memory_space<vmem>>, vector<128x42xf32>
    %1 = arith.truncf %0 : vector<128x42xf32> to vector<128x42xbf16>
    %c0_1 = arith.constant 0 : index
    %c0_2 = arith.constant 0 : index
    %2 = vector.load %arg2[%c0_1, %c0_2] : memref<512x42xbf16, #tpu.memory_space<vmem>>, vector<512x42xbf16>
    %cst = arith.constant dense<0.000000e+00> : vector<512x128xf32>
    %3 = tpu.matmul %2, %1, %cst {dimension_numbers = #tpu.dot_dimension_numbers<[1], [1], [0], [0], [0, 0, 1, 0], [], []>} : vector<512x42xbf16>, vector<128x42xbf16>, vector<512x128xf32> -> vector<512x128xf32>
    %c0_3 = arith.constant 0 : index
    %c0_4 = arith.constant 0 : index
    %4 = vector.load %arg3[%c0_3, %c0_4] : memref<512x1xf32, #tpu.memory_space<vmem>>, vector<512x1xf32>
    %5 = vector.broadcast %4 : vector<512x1xf32> to vector<512x128xf32>
    %6 = arith.addf %3, %5 : vector<512x128xf32>
    %cst_5 = arith.constant 2.000000e-01 : f32
    %7 = vector.broadcast %cst_5 : f32 to vector<512x128xf32>
    %8 = arith.mulf %7, %6 : vector<512x128xf32>
    %9 = arith.maximumf %6, %8 : vector<512x128xf32>
    %c0_6 = arith.constant 0 : index
    %c0_7 = arith.constant 0 : index
    %10 = vector.load %arg4[%c0_6, %c0_7] : memref<256x512xbf16, #tpu.memory_space<vmem>>, vector<256x512xbf16>
    %11 = arith.truncf %9 : vector<512x128xf32> to vector<512x128xbf16>
    %cst_8 = arith.constant dense<0.000000e+00> : vector<256x128xf32>
    %12 = tpu.matmul %10, %11, %cst_8 {dimension_numbers = #tpu.dot_dimension_numbers<[1], [0], [0], [1], [0, 0, 1, 1], [], []>} : vector<256x512xbf16>, vector<512x128xbf16>, vector<256x128xf32> -> vector<256x128xf32>
    %c0_9 = arith.constant 0 : index
    %c0_10 = arith.constant 0 : index
    %13 = vector.load %arg5[%c0_9, %c0_10] : memref<256x1xf32, #tpu.memory_space<vmem>>, vector<256x1xf32>
    %14 = vector.broadcast %13 : vector<256x1xf32> to vector<256x128xf32>
    %15 = arith.addf %12, %14 : vector<256x128xf32>
    %cst_11 = arith.constant 2.000000e-01 : f32
    %16 = vector.broadcast %cst_11 : f32 to vector<256x128xf32>
    %17 = arith.mulf %16, %15 : vector<256x128xf32>
    %18 = arith.maximumf %15, %17 : vector<256x128xf32>
    %c0_12 = arith.constant 0 : index
    %c0_13 = arith.constant 0 : index
    %19 = vector.load %arg6[%c0_12, %c0_13] : memref<128x256xbf16, #tpu.memory_space<vmem>>, vector<128x256xbf16>
    %20 = arith.truncf %18 : vector<256x128xf32> to vector<256x128xbf16>
    %cst_14 = arith.constant dense<0.000000e+00> : vector<128x128xf32>
    %21 = tpu.matmul %19, %20, %cst_14 {dimension_numbers = #tpu.dot_dimension_numbers<[1], [0], [0], [1], [0, 0, 1, 1], [], []>} : vector<128x256xbf16>, vector<256x128xbf16>, vector<128x128xf32> -> vector<128x128xf32>
    %c0_15 = arith.constant 0 : index
    %c0_16 = arith.constant 0 : index
    %22 = vector.load %arg7[%c0_15, %c0_16] : memref<128x1xf32, #tpu.memory_space<vmem>>, vector<128x1xf32>
    %23 = vector.broadcast %22 : vector<128x1xf32> to vector<128x128xf32>
    %24 = arith.addf %21, %23 : vector<128x128xf32>
    %cst_17 = arith.constant 2.000000e-01 : f32
    %25 = vector.broadcast %cst_17 : f32 to vector<128x128xf32>
    %26 = arith.mulf %25, %24 : vector<128x128xf32>
    %27 = arith.maximumf %24, %26 : vector<128x128xf32>
    %c0_18 = arith.constant 0 : index
    %c0_19 = arith.constant 0 : index
    %28 = vector.load %arg8[%c0_18, %c0_19] : memref<128x1xf32, #tpu.memory_space<vmem>>, vector<128x1xf32>
    %29 = vector.broadcast %28 : vector<128x1xf32> to vector<128x128xf32>
    %30 = arith.mulf %27, %29 : vector<128x128xf32>
    %cst_20 = arith.constant dense<0.000000e+00> : vector<128xf32>
    %31 = vector.multi_reduction <add>, %30, %cst_20 [0] : vector<128x128xf32> to vector<128xf32>
    %32 = vector.shape_cast %31 : vector<128xf32> to vector<1x128xf32>
    %c0_21 = arith.constant 0 : index
    %c0_22 = arith.constant 0 : index
    %33 = vector.load %arg9[%c0_21, %c0_22] : memref<1x1xf32, #tpu.memory_space<vmem>>, vector<1x1xf32>
    %34 = vector.broadcast %33 : vector<1x1xf32> to vector<1x128xf32>
    %35 = arith.addf %32, %34 : vector<1x128xf32>
    %c0_23 = arith.constant 0 : index
    %c0_24 = arith.constant 0 : index
    %36 = vector.load %arg10[%c0_23, %c0_24] : memref<1x128xf32, #tpu.memory_space<vmem>>, vector<1x128xf32>
    tpu.vector_store %arg10[%c0_23, %c0_24], %35 {strides = array<i32>} : memref<1x128xf32, #tpu.memory_space<vmem>>, vector<1x128xf32>,
    return
  }
  func.func @transform_0(%arg0: i32) -> (i32, i32) {
    %c0_i32 = arith.constant 0 : i32
    %c0_i32_0 = arith.constant 0 : i32
    return %arg0, %c0_i32 : i32, i32
  }
  func.func @transform_1(%arg0: i32) -> (i32, i32) {
    %c0_i32 = arith.constant 0 : i32
    %c0_i32_0 = arith.constant 0 : i32
    %c0_i32_1 = arith.constant 0 : i32
    return %c0_i32, %c0_i32_0 : i32, i32
  }
  func.func @transform_2(%arg0: i32) -> (i32, i32) {
    %c0_i32 = arith.constant 0 : i32
    %c0_i32_0 = arith.constant 0 : i32
    %c0_i32_1 = arith.constant 0 : i32
    return %c0_i32, %c0_i32_0 : i32, i32
  }
  func.func @transform_3(%arg0: i32) -> (i32, i32) {
    %c0_i32 = arith.constant 0 : i32
    %c0_i32_0 = arith.constant 0 : i32
    %c0_i32_1 = arith.constant 0 : i32
    return %c0_i32, %c0_i32_0 : i32, i32
  }
  func.func @transform_4(%arg0: i32) -> (i32, i32) {
    %c0_i32 = arith.constant 0 : i32
    %c0_i32_0 = arith.constant 0 : i32
    %c0_i32_1 = arith.constant 0 : i32
    return %c0_i32, %c0_i32_0 : i32, i32
  }
  func.func @transform_5(%arg0: i32) -> (i32, i32) {
    %c0_i32 = arith.constant 0 : i32
    %c0_i32_0 = arith.constant 0 : i32
    %c0_i32_1 = arith.constant 0 : i32
    return %c0_i32, %c0_i32_0 : i32, i32
  }
  func.func @transform_6(%arg0: i32) -> (i32, i32) {
    %c0_i32 = arith.constant 0 : i32
    %c0_i32_0 = arith.constant 0 : i32
    %c0_i32_1 = arith.constant 0 : i32
    return %c0_i32, %c0_i32_0 : i32, i32
  }
  func.func @transform_7(%arg0: i32) -> (i32, i32) {
    %c0_i32 = arith.constant 0 : i32
    %c0_i32_0 = arith.constant 0 : i32
    %c0_i32_1 = arith.constant 0 : i32
    return %c0_i32, %c0_i32_0 : i32, i32
  }
  func.func @transform_8(%arg0: i32) -> (i32, i32) {
    %c0_i32 = arith.constant 0 : i32
    %c0_i32_0 = arith.constant 0 : i32
    %c0_i32_1 = arith.constant 0 : i32
    return %c0_i32, %c0_i32_0 : i32, i32
  }
  func.func @transform_9(%arg0: i32) -> (i32, i32) {
    %c0_i32 = arith.constant 0 : i32
    %c0_i32_0 = arith.constant 0 : i32
    return %c0_i32, %arg0 : i32, i32
  }
}

</mosaic_0001>

<bundles_post_ra>
// kernel: discriminator_forward.1
= control target key start
LH: loop header
LB: loop body
LE: loop exit
PB: predicated region body
PF: predicated region fallthrough
CT: control target
= control target key end

     0   :  { %v3400_v0 = vmov 0   ;;  %vm667_vm0 = vcmask 343040   ;;  %s4793_s2 = inlined_call_operand.vmem [shape: f32[512,1], index: 2, kind: input, shape index: {}]   ;;  %s4794_s0 = inlined_call_operand.vmem [shape: f32[128,42], index: 0, kind: input, shape index: {}]   ;;  %s4795_s1 = inlined_call_operand.vmem [shape: bf16[512,42], index: 1, kind: input, shape index: {}]   ;;  %s4796_s8 = inlined_call_operand.<no memory space> [shape: f32[1,1], index: 8, kind: input, shape index: {}]   ;;  %s4797_s4 = inlined_call_operand.vmem [shape: f32[256,1], index: 4, kind: input, shape index: {}]   ;;  %s4798_s6 = inlined_call_operand.vmem [shape: f32[128,1], index: 6, kind: input, shape index: {}]   ;;  %s4799_s7 = inlined_call_operand.vmem [shape: f32[128,1], index: 7, kind: input, shape index: {}]   ;;  %s4800_s3 = inlined_call_operand.vmem [shape: bf16[256,512], index: 3, kind: input, shape index: {}]   ;;  %s4801_s5 = inlined_call_operand.vmem [shape: bf16[128,256], index: 5, kind: input, shape index: {}]   ;;  %s4802_s9 = inlined_call_operand.vmem [shape: f32[1,128], index: 9, kind: output, shape index: {}]  }
   0x1   :  { %3247 = vset.pattern.permute.xlu1 %v3400_v0  ;;  %3246 = vset.pattern.permute.xlu0 %v3400_v0  ;;  %v153_v1 = vld [vmem:[%s4793_s2 + $0xf0] sm:$0xff]  ;;  %v50_v4 = vld [vmem:[%s4794_s0 + $0x78] sm:$0xff]  ;;  %v47_v7 = vld [vmem:[%s4794_s0 + $0x60] sm:$0xff] }
   0x2   :  { %v137_v2 = vld [vmem:[%s4793_s2 + $0x70] sm:$0xff]  ;;  %339 = vperm.xlu0 %3246, %v153_v1   ;;  %v154_v6 = vld [vmem:[%s4793_s2 + $0xf8] sm:$0xff]  ;;  %v48_v9 = vld [vmem:[%s4794_s0 + $0x68] sm:$0xff] }
   0x3   :  { %v49_v3 = vld [vmem:[%s4794_s0 + $0x70] sm:$0xff]  ;;  %259 = vperm.xlu1 %3247, %v137_v2   ;;  %v138_v8 = vld [vmem:[%s4793_s2 + $0x78] sm:$0xff]  ;;  %v57_v11 = vpack.c.bf16 %v48_v9, %v47_v7  ;;  %v151_v12 = vld [vmem:[%s4793_s2 + $0xe0] sm:$0xff] }
   0x4   :  { %v58_v5 = vpack.c.bf16 %v50_v4, %v49_v3  ;;  %v152_v13 = vld [vmem:[%s4793_s2 + $0xe8] sm:$0xff]  ;;  %v45_v14 = vld [vmem:[%s4794_s0 + $0x50] sm:$0xff]  ;;  %v46_v15 = vld [vmem:[%s4794_s0 + $0x58] sm:$0xff] }
   0x5   :  { %v783_v16 = vsel %vm667_vm0, %v57_v11, 0  ;;  %v135_v17 = vld [vmem:[%s4793_s2 + $0x60] sm:$0xff]  ;;  %v56_v18 = vpack.c.bf16 %v46_v15, %v45_v14  ;;  %v136_v19 = vld [vmem:[%s4793_s2 + $0x68] sm:$0xff]  ;;  %v149_v20 = vld [vmem:[%s4793_s2 + $0xd0] sm:$0xff] }
   0x6   :  { %3237 = vmatprep.subr.msk.bf16.mxu0 %vm667_vm0, %v58_v5  ;;  %v786_v10 = vsel %vm667_vm0, %v58_v5, 0  ;;  %344 = vperm.xlu0 %3246, %v154_v6   ;;  %v150_v21 = vld [vmem:[%s4793_s2 + $0xd8] sm:$0xff]  ;;  %v43_v22 = vld [vmem:[%s4794_s0 + $0x40] sm:$0xff]  ;;  %v44_v23 = vld [vmem:[%s4794_s0 + $0x48] sm:$0xff] }
   0x7   :  { %3158 = vmatpush3.bf16.xpose.msra.mxu0 %v786_v10  ;;  %264 = vperm.xlu1 %3247, %v138_v8   ;;  %v3248_v24 = vld [vmem:[%s4795_s1] sm:$0xff]   ;;  %v780_v25 = vsel %vm667_vm0, %v56_v18, 0  ;;  %v133_v26 = vld [vmem:[%s4793_s2 + $0x50] sm:$0xff]  ;;  %v55_v27 = vpack.c.bf16 %v44_v23, %v43_v22  ;;  %v134_v28 = vld [vmem:[%s4793_s2 + $0x58] sm:$0xff] }
   0x8   :  { %3238 = vmatprep.subr.msk.bf16.mxu0 %vm667_vm0, %v57_v11  ;;  %3173 = vmatprep.mubr.msk.bf16.mxu0 %vm667_vm0, %v3248_v24  ;;  %v148_v29 = vld [vmem:[%s4793_s2 + $0xc8] sm:$0xff]  ;;  %v147_v30 = vld [vmem:[%s4793_s2 + $0xc0] sm:$0xff]  ;;  %v41_v31 = vld [vmem:[%s4794_s0 + $0x30] sm:$0xff] }
   0x9   :  { %v42_v32 = vld [vmem:[%s4794_s0 + $0x38] sm:$0xff]  ;;  %v777_v33 = vsel %vm667_vm0, %v55_v27, 0  ;;  %v131_v34 = vld [vmem:[%s4793_s2 + $0x40] sm:$0xff]  ;;  %v132_v36 = vld [vmem:[%s4793_s2 + $0x48] sm:$0xff] }
   0xa   :  { %329 = vperm.xlu0 %3246, %v151_v12   ;;  %v54_v35 = vpack.c.bf16 %v42_v32, %v41_v31  ;;  %v146_v37 = vld [vmem:[%s4793_s2 + $0xb8] sm:$0xff]  ;;  %v145_v38 = vld [vmem:[%s4793_s2 + $0xb0] sm:$0xff]  ;;  %v39_v39 = vld [vmem:[%s4794_s0 + $0x20] sm:$0xff] }
   0xb   :  { %334 = vperm.xlu1 %3247, %v152_v13   ;;  %v40_v40 = vld [vmem:[%s4794_s0 + $0x28] sm:$0xff]  ;;  %v129_v42 = vld [vmem:[%s4793_s2 + $0x30] sm:$0xff]  ;;  %v130_v44 = vld [vmem:[%s4793_s2 + $0x38] sm:$0xff] }
   0xc   :  { %v774_v41 = vsel %vm667_vm0, %v54_v35, 0  ;;  %v53_v43 = vpack.c.bf16 %v40_v40, %v39_v39  ;;  %v143_v45 = vld [vmem:[%s4793_s2 + $0xa0] sm:$0xff]  ;;  %v144_v46 = vld [vmem:[%s4793_s2 + $0xa8] sm:$0xff]  ;;  %v37_v47 = vld [vmem:[%s4794_s0 + $0x10] sm:$0xff] }
   0xd   :  { %v38_v48 = vld [vmem:[%s4794_s0 + $0x18] sm:$0xff]  ;;  %v127_v50 = vld [vmem:[%s4793_s2 + $0x20] sm:$0xff]  ;;  %v128_v52 = vld [vmem:[%s4793_s2 + $0x28] sm:$0xff] }
   0xe   :  { %249 = vperm.xlu0 %3246, %v135_v17   ;;  %v771_v49 = vsel %vm667_vm0, %v53_v43, 0  ;;  %v52_v51 = vpack.c.bf16 %v38_v48, %v37_v47  ;;  %v142_v53 = vld [vmem:[%s4793_s2 + $0x98] sm:$0xff]  ;;  %v141_v54 = vld [vmem:[%s4793_s2 + $0x90] sm:$0xff]  ;;  %v35_v55 = vld [vmem:[%s4794_s0] sm:$0xff]  ;;  %v14_v48 = vstv %s4796_s8 }
   0xf   :  { %3160 = vmatpush3.bf16.xpose.msra.mxu0 %v783_v16  ;;  %254 = vperm.xlu1 %3247, %v136_v19   ;;  %v36_v56 = vld [vmem:[%s4794_s0 + $0x8] sm:$0xff]  ;;  %v125_v58 = vld [vmem:[%s4793_s2 + $0x10] sm:$0xff]  ;;  %v126_v60 = vld [vmem:[%s4793_s2 + $0x18] sm:$0xff]  ;;  %15 = vst [vmem:[#allocation2] sm:$0x1] %v14_v48 }
  0x10   :  { %3239 = vmatprep.subr.msk.bf16.mxu0 %vm667_vm0, %v56_v18  ;;  %v768_v57 = vsel %vm667_vm0, %v52_v51, 0  ;;  %v51_v59 = vpack.c.bf16 %v36_v56, %v35_v55  ;;  %v139_v61 = vld [vmem:[%s4793_s2 + $0x80] sm:$0xff]  ;;  %v140_v62 = vld [vmem:[%s4793_s2 + $0x88] sm:$0xff]  ;;  %v185_v2 = vld [vmem:[%s4793_s2 + $0x1f0] sm:$0xff] }
  0x11   :  { %v123_v0 = vld [vmem:[%s4793_s2] sm:$0xff]  ;;  %v124_v1 = vld [vmem:[%s4793_s2 + $0x8] sm:$0xff]  ;;  %v186_v3 = vld [vmem:[%s4793_s2 + $0x1f8] sm:$0xff] }
  0x12   :  { %319 = vperm.xlu0 %3246, %v149_v20   ;;  %v765_v63 = vsel %vm667_vm0, %v51_v59, 0  ;;  %v3249_v4 = vld [vmem:[%s4795_s1 + $0x8] sm:$0xff]   ;;  %v3250_v5 = vld [vmem:[%s4795_s1 + $0x10] sm:$0xff]   ;;  %v170_v7 = vld [vmem:[%s4793_s2 + $0x178] sm:$0xff] }
  0x13   :  { %324 = vperm.xlu1 %3247, %v150_v21   ;;  %v169_v6 = vld [vmem:[%s4793_s2 + $0x170] sm:$0xff]  ;;  %v183_v8 = vld [vmem:[%s4793_s2 + $0x1e0] sm:$0xff]  ;;  %v184_v9 = vld [vmem:[%s4793_s2 + $0x1e8] sm:$0xff] }
  0x14   :  { %v3251_v10 = vld [vmem:[%s4795_s1 + $0x18] sm:$0xff]   ;;  %v3252_v11 = vld [vmem:[%s4795_s1 + $0x20] sm:$0xff]   ;;  %v168_v13 = vld [vmem:[%s4793_s2 + $0x168] sm:$0xff] }
  0x15   :  { %v167_v12 = vld [vmem:[%s4793_s2 + $0x160] sm:$0xff]  ;;  %v181_v14 = vld [vmem:[%s4793_s2 + $0x1d0] sm:$0xff]  ;;  %v182_v15 = vld [vmem:[%s4793_s2 + $0x1d8] sm:$0xff] }
  0x16   :  { %239 = vperm.xlu0 %3246, %v133_v26   ;;  %v3253_v16 = vld [vmem:[%s4795_s1 + $0x28] sm:$0xff]   ;;  %v3254_v17 = vld [vmem:[%s4795_s1 + $0x30] sm:$0xff]   ;;  %v166_v19 = vld [vmem:[%s4793_s2 + $0x158] sm:$0xff] }
  0x17   :  { %3162 = vmatpush3.bf16.xpose.msra.mxu0 %v780_v25  ;;  %244 = vperm.xlu1 %3247, %v134_v28   ;;  %v165_v18 = vld [vmem:[%s4793_s2 + $0x150] sm:$0xff]  ;;  %v179_v20 = vld [vmem:[%s4793_s2 + $0x1c0] sm:$0xff]  ;;  %v180_v21 = vld [vmem:[%s4793_s2 + $0x1c8] sm:$0xff] }
  0x18   :  { %3240 = vmatprep.subr.msk.bf16.mxu0 %vm667_vm0, %v55_v27  ;;  %v3255_v22 = vld [vmem:[%s4795_s1 + $0x38] sm:$0xff]   ;;  %v3256_v23 = vld [vmem:[%s4795_s1 + $0x40] sm:$0xff]   ;;  %v164_v25 = vld [vmem:[%s4793_s2 + $0x148] sm:$0xff] }
  0x19   :  { %v163_v24 = vld [vmem:[%s4793_s2 + $0x140] sm:$0xff]  ;;  %v177_v26 = vld [vmem:[%s4793_s2 + $0x1b0] sm:$0xff]  ;;  %v178_v27 = vld [vmem:[%s4793_s2 + $0x1b8] sm:$0xff] }
  0x1a   :  { %309 = vperm.xlu0 %3246, %v147_v30   ;;  %v3257_v28 = vld [vmem:[%s4795_s1 + $0x48] sm:$0xff]   ;;  %v161_v30 = vld [vmem:[%s4793_s2 + $0x130] sm:$0xff]  ;;  %v162_v31 = vld [vmem:[%s4793_s2 + $0x138] sm:$0xff] }
  0x1b   :  { %314 = vperm.xlu1 %3247, %v148_v29   ;;  %v3258_v29 = vld [vmem:[%s4795_s1 + $0x50] sm:$0xff]   ;;  %v175_v32 = vld [vmem:[%s4793_s2 + $0x1a0] sm:$0xff]  ;;  %v174_v39 = vld [vmem:[%s4793_s2 + $0x198] sm:$0xff] }
  0x1c   :  { %v3261_v40 = vld [vmem:[%s4795_s1 + $0x68] sm:$0xff]   ;;  %v3264_v47 = vld [vmem:[%s4795_s1 + $0x80] sm:$0xff]   ;;  %v1315_v55 = vld [vmem:[%s4797_s4 + $0x70] sm:$0xff] }
  0x1d   :  { %v1316_v56 = vld [vmem:[%s4797_s4 + $0x78] sm:$0xff]  ;;  %v1301_v48 = vld [vmem:[%s4797_s4] sm:$0xff] }
  0x1e   :  { %229 = vperm.xlu0 %3246, %v131_v34   ;;  %v3259_v34 = vld [vmem:[%s4795_s1 + $0x58] sm:$0xff]  }
  0x1f   :  { %3164 = vmatpush3.bf16.xpose.msra.mxu0 %v777_v33  ;;  %234 = vperm.xlu1 %3247, %v132_v36   ;;  %v176_v33 = vld [vmem:[%s4793_s2 + $0x1a8] sm:$0xff]  ;;  %v159_v36 = vld [vmem:[%s4793_s2 + $0x120] sm:$0xff] }
  0x20   :  { %3241 = vmatprep.subr.msk.bf16.mxu0 %vm667_vm0, %v54_v35  ;;  %v3260_v35 = vld [vmem:[%s4795_s1 + $0x60] sm:$0xff]  }
  0x22   :  { %299 = vperm.xlu0 %3246, %v145_v38   ;;  %v173_v38 = vld [vmem:[%s4793_s2 + $0x190] sm:$0xff] }
  0x23   :  { %304 = vperm.xlu1 %3247, %v146_v37   ;;  %v160_v37 = vld [vmem:[%s4793_s2 + $0x128] sm:$0xff] }
  0x26   :  { %219 = vperm.xlu0 %3246, %v129_v42   ;;  %v157_v42 = vld [vmem:[%s4793_s2 + $0x110] sm:$0xff] }
  0x27   :  { %3166 = vmatpush3.bf16.xpose.msra.mxu0 %v774_v41  ;;  %224 = vperm.xlu1 %3247, %v130_v44   ;;  %v3262_v41 = vld [vmem:[%s4795_s1 + $0x70] sm:$0xff]   ;;  %v171_v44 = vld [vmem:[%s4793_s2 + $0x180] sm:$0xff] }
  0x28   :  { %3242 = vmatprep.subr.msk.bf16.mxu0 %vm667_vm0, %v53_v43  ;;  %v158_v43 = vld [vmem:[%s4793_s2 + $0x118] sm:$0xff] }
  0x2a   :  { %289 = vperm.xlu0 %3246, %v143_v45   ;;  %v172_v45 = vld [vmem:[%s4793_s2 + $0x188] sm:$0xff] }
  0x2b   :  { %294 = vperm.xlu1 %3247, %v144_v46   ;;  %v3263_v46 = vld [vmem:[%s4795_s1 + $0x78] sm:$0xff]  }
  0x2e   :  { %209 = vperm.xlu0 %3246, %v127_v50   ;;  %v156_v50 = vld [vmem:[%s4793_s2 + $0x108] sm:$0xff] }
  0x2f   :  { %3168 = vmatpush3.bf16.xpose.msra.mxu0 %v771_v49  ;;  %214 = vperm.xlu1 %3247, %v128_v52   ;;  %v155_v49 = vld [vmem:[%s4793_s2 + $0x100] sm:$0xff]  ;;  %v1332_v52 = vld [vmem:[%s4797_s4 + $0xf8] sm:$0xff] }
  0x30   :  { %3243 = vmatprep.subr.msk.bf16.mxu0 %vm667_vm0, %v52_v51  ;;  %v1331_v51 = vld [vmem:[%s4797_s4 + $0xf0] sm:$0xff] }
  0x32   :  { %279 = vperm.xlu0 %3246, %v141_v54   ;;  %v3266_v54 = vld [vmem:[%s4795_s1 + $0x90] sm:$0xff]  }
  0x33   :  { %284 = vperm.xlu1 %3247, %v142_v53   ;;  %v3265_v53 = vld [vmem:[%s4795_s1 + $0x88] sm:$0xff]  }
  0x36   :  { %199 = vperm.xlu0 %3246, %v125_v58   ;;  %v1330_v58 = vld [vmem:[%s4797_s4 + $0xe8] sm:$0xff] }
  0x37   :  { %3170 = vmatpush3.bf16.xpose.msra.mxu0 %v768_v57  ;;  %204 = vperm.xlu1 %3247, %v126_v60   ;;  %v1329_v57 = vld [vmem:[%s4797_s4 + $0xe0] sm:$0xff] }
  0x38   :  { %3244 = vmatprep.subr.msk.bf16.mxu0 %vm667_vm0, %v51_v59  ;;  %v3267_v59 = vld [vmem:[%s4795_s1 + $0x98] sm:$0xff]   ;;  %v3268_v60 = vld [vmem:[%s4795_s1 + $0xa0] sm:$0xff]  }
  0x3a   :  { %269 = vperm.xlu0 %3246, %v139_v61   ;;  %v1313_v61 = vld [vmem:[%s4797_s4 + $0x60] sm:$0xff] }
  0x3b   :  { %274 = vperm.xlu1 %3247, %v140_v62   ;;  %v1314_v62 = vld [vmem:[%s4797_s4 + $0x68] sm:$0xff] }
  0x3e   :  { %189 = vperm.xlu0 %3246, %v123_v0   ;;  %v1327_v0 = vld [vmem:[%s4797_s4 + $0xd0] sm:$0xff] }
  0x3f   :  { %3172 = vmatpush3.bf16.xpose.msra.mxu0 %v765_v63  ;;  %194 = vperm.xlu1 %3247, %v124_v1   ;;  %v1328_v1 = vld [vmem:[%s4797_s4 + $0xd8] sm:$0xff] }
  0x42   :  { %499 = vperm.xlu0 %3246, %v185_v2  }
  0x43   :  { %504 = vperm.xlu1 %3247, %v186_v3   ;;  %v3269_v3 = vld [vmem:[%s4795_s1 + $0xa8] sm:$0xff]  }
  0x46   :  { %3174 = vmatmul.mubr.msk.bf16.vlgmr.msra.gmra.mxu0 %vm667_vm0, %v3249_v4  ;;  %419 = vperm.xlu0 %3246, %v169_v6   ;;  %v3270_v4 = vld [vmem:[%s4795_s1 + $0xb0] sm:$0xff]  }
  0x47   :  { %3177 = vmatprep.mubr.msk.bf16.mxu0 %vm667_vm0, %v3250_v5  ;;  %424 = vperm.xlu1 %3247, %v170_v7   ;;  %v1311_v6 = vld [vmem:[%s4797_s4 + $0x50] sm:$0xff]  ;;  %v1312_v7 = vld [vmem:[%s4797_s4 + $0x58] sm:$0xff] }
  0x4a   :  { %489 = vperm.xlu0 %3246, %v183_v8  }
  0x4b   :  { %494 = vperm.xlu1 %3247, %v184_v9   ;;  %v1325_v9 = vld [vmem:[%s4797_s4 + $0xc0] sm:$0xff] }
  0x4e   :  { %3178 = vmatmul.mubr.msk.bf16.gmra.mxu0 %vm667_vm0, %v3251_v10  ;;  %409 = vperm.xlu0 %3246, %v167_v12   ;;  %v1326_v10 = vld [vmem:[%s4797_s4 + $0xc8] sm:$0xff]  ;;  %v3271_v12 = vld [vmem:[%s4795_s1 + $0xb8] sm:$0xff]  }
  0x4f   :  { %3181 = vmatprep.mubr.msk.bf16.mxu0 %vm667_vm0, %v3252_v11  ;;  %414 = vperm.xlu1 %3247, %v168_v13   ;;  %v3272_v13 = vld [vmem:[%s4795_s1 + $0xc0] sm:$0xff]  }
  0x52   :  { %479 = vperm.xlu0 %3246, %v181_v14   ;;  %v1309_v14 = vld [vmem:[%s4797_s4 + $0x40] sm:$0xff] }
  0x53   :  { %484 = vperm.xlu1 %3247, %v182_v15   ;;  %v1310_v15 = vld [vmem:[%s4797_s4 + $0x48] sm:$0xff] }
  0x56   :  { %3182 = vmatmul.mubr.msk.bf16.gmra.mxu0 %vm667_vm0, %v3253_v16  ;;  %399 = vperm.xlu0 %3246, %v165_v18   ;;  %v1323_v18 = vld [vmem:[%s4797_s4 + $0xb0] sm:$0xff] }
  0x57   :  { %3185 = vmatprep.mubr.msk.bf16.mxu0 %vm667_vm0, %v3254_v17  ;;  %404 = vperm.xlu1 %3247, %v166_v19   ;;  %v1324_v19 = vld [vmem:[%s4797_s4 + $0xb8] sm:$0xff] }
  0x5a   :  { %469 = vperm.xlu0 %3246, %v179_v20   ;;  %v3273_v20 = vld [vmem:[%s4795_s1 + $0xc8] sm:$0xff]  }
  0x5b   :  { %474 = vperm.xlu1 %3247, %v180_v21   ;;  %v3274_v21 = vld [vmem:[%s4795_s1 + $0xd0] sm:$0xff]  }
  0x5e   :  { %3186 = vmatmul.mubr.msk.bf16.gmra.mxu0 %vm667_vm0, %v3255_v22  ;;  %389 = vperm.xlu0 %3246, %v163_v24   ;;  %v1308_v24 = vld [vmem:[%s4797_s4 + $0x38] sm:$0xff] }
  0x5f   :  { %3189 = vmatprep.mubr.msk.bf16.mxu0 %vm667_vm0, %v3256_v23  ;;  %394 = vperm.xlu1 %3247, %v164_v25   ;;  %v1307_v23 = vld [vmem:[%s4797_s4 + $0x30] sm:$0xff] }
  0x62   :  { %459 = vperm.xlu0 %3246, %v177_v26   ;;  %v1321_v26 = vld [vmem:[%s4797_s4 + $0xa0] sm:$0xff] }
  0x63   :  { %464 = vperm.xlu1 %3247, %v178_v27   ;;  %v1322_v27 = vld [vmem:[%s4797_s4 + $0xa8] sm:$0xff] }
  0x66   :  { %3190 = vmatmul.mubr.msk.bf16.gmra.mxu0 %vm667_vm0, %v3257_v28  ;;  %379 = vperm.xlu0 %3246, %v161_v30   ;;  %v3276_v30 = vld [vmem:[%s4795_s1 + $0xe0] sm:$0xff]  }
  0x67   :  { %3193 = vmatprep.mubr.msk.bf16.mxu0 %vm667_vm0, %v3258_v29  ;;  %384 = vperm.xlu1 %3247, %v162_v31   ;;  %v3275_v29 = vld [vmem:[%s4795_s1 + $0xd8] sm:$0xff]  }
  0x6a   :  { %449 = vperm.xlu0 %3246, %v175_v32   ;;  %v1305_v32 = vld [vmem:[%s4797_s4 + $0x20] sm:$0xff] }
  0x6b   :  { %454 = vperm.xlu1 %3247, %v176_v33   ;;  %v1306_v33 = vld [vmem:[%s4797_s4 + $0x28] sm:$0xff] }
  0x6e   :  { %3194 = vmatmul.mubr.msk.bf16.gmra.mxu0 %vm667_vm0, %v3259_v34  ;;  %369 = vperm.xlu0 %3246, %v159_v36   ;;  %v1320_v36 = vld [vmem:[%s4797_s4 + $0x98] sm:$0xff] }
  0x6f   :  { %3197 = vmatprep.mubr.msk.bf16.mxu0 %vm667_vm0, %v3260_v35  ;;  %374 = vperm.xlu1 %3247, %v160_v37   ;;  %v1319_v35 = vld [vmem:[%s4797_s4 + $0x90] sm:$0xff] }
  0x72   :  { %439 = vperm.xlu0 %3246, %v173_v38   ;;  %v3277_v38 = vld [vmem:[%s4795_s1 + $0xe8] sm:$0xff]  }
  0x73   :  { %444 = vperm.xlu1 %3247, %v174_v39   ;;  %v3278_v39 = vld [vmem:[%s4795_s1 + $0xf0] sm:$0xff]  }
  0x76   :  { %3198 = vmatmul.mubr.msk.bf16.gmra.mxu0 %vm667_vm0, %v3261_v40  ;;  %359 = vperm.xlu0 %3246, %v157_v42   ;;  %v1303_v40 = vld [vmem:[%s4797_s4 + $0x10] sm:$0xff] }
  0x77   :  { %3201 = vmatprep.mubr.msk.bf16.mxu0 %vm667_vm0, %v3262_v41  ;;  %364 = vperm.xlu1 %3247, %v158_v43   ;;  %v1304_v41 = vld [vmem:[%s4797_s4 + $0x18] sm:$0xff] }
  0x7a   :  { %429 = vperm.xlu0 %3246, %v171_v44   ;;  %v1317_v44 = vld [vmem:[%s4797_s4 + $0x80] sm:$0xff] }
  0x7b   :  { %434 = vperm.xlu1 %3247, %v172_v45   ;;  %v1318_v45 = vld [vmem:[%s4797_s4 + $0x88] sm:$0xff] }
  0x7d   :  { %v3816_v63 = vpop.permute.xlu0 %339 }
  0x7e   :  { %3202 = vmatmul.mubr.msk.bf16.gmra.mxu0 %vm667_vm0, %v3263_v46  ;;  %349 = vperm.xlu0 %3246, %v155_v49   ;;  %v3826_v2 = vpop.permute.xlu1 %259  ;;  %v3279_v46 = vld [vmem:[%s4795_s1 + $0xf8] sm:$0xff]   ;;  %v1302_v49 = vld [vmem:[%s4797_s4 + $0x8] sm:$0xff] }
  0x7f   :  { %3205 = vmatprep.mubr.msk.bf16.mxu0 %vm667_vm0, %v3264_v47  ;;  %354 = vperm.xlu1 %3247, %v156_v50  }
  0x81   :  { %v3834_v5 = vpop.permute.xlu0 %344 }
  0x82   :  { %1485 = vperm.xlu0 %3246, %v1331_v51   ;;  %v3844_v8 = vpop.permute.xlu1 %264  ;;  %v2231_v51 = vld [vmem:[%s4798_s6] sm:$0xff] }
  0x83   :  { %1490 = vperm.xlu1 %3247, %v1332_v52   ;;  %v2232_v52 = vld [vmem:[%s4798_s6 + $0x8] sm:$0xff] }
  0x85   :  { %v3852_v11 = vpop.permute.xlu0 %329 }
  0x86   :  { %3206 = vmatmul.mubr.msk.bf16.gmra.mxu0 %vm667_vm0, %v3265_v53  ;;  %1405 = vperm.xlu0 %3246, %v1315_v55   ;;  %v3866_v16 = vpop.permute.xlu1 %334  ;;  %v2233_v55 = vld [vmem:[%s4798_s6 + $0x10] sm:$0xff] }
  0x87   :  { %3209 = vmatprep.mubr.msk.bf16.mxu0 %vm667_vm0, %v3266_v54  ;;  %1410 = vperm.xlu1 %3247, %v1316_v56   ;;  %v2234_v56 = vld [vmem:[%s4798_s6 + $0x18] sm:$0xff] }
  0x89   :  { %v3870_v17 = vpop.permute.xlu0 %249 }
  0x8a   :  { %1475 = vperm.xlu0 %3246, %v1329_v57   ;;  %v3884_v22 = vpop.permute.xlu1 %254 }
  0x8b   :  { %1480 = vperm.xlu1 %3247, %v1330_v58   ;;  %v2235_v58 = vld [vmem:[%s4798_s6 + $0x20] sm:$0xff] }
  0x8d   :  { %v3892_v25 = vpop.permute.xlu0 %319 }
  0x8e   :  { %3210 = vmatmul.mubr.msk.bf16.gmra.mxu0 %vm667_vm0, %v3267_v59  ;;  %1395 = vperm.xlu0 %3246, %v1313_v61   ;;  %v3902_v28 = vpop.permute.xlu1 %324  ;;  %v2236_v59 = vld [vmem:[%s4798_s6 + $0x28] sm:$0xff]  ;;  %v2536_v61 = vld [vmem:[%s4799_s7] sm:$0xff] }
  0x8f   :  { %3213 = vmatprep.mubr.msk.bf16.mxu0 %vm667_vm0, %v3268_v60  ;;  %1400 = vperm.xlu1 %3247, %v1314_v62   ;;  %v2537_v62 = vld [vmem:[%s4799_s7 + $0x8] sm:$0xff] }
  0x91   :  { %v3910_v31 = vpop.permute.xlu0 %239 }
  0x92   :  { %1465 = vperm.xlu0 %3246, %v1327_v0   ;;  %v3920_v34 = vpop.permute.xlu1 %244 }
  0x93   :  { %1470 = vperm.xlu1 %3247, %v1328_v1  }
  0x95   :  { %v3928_v37 = vpop.permute.xlu0 %309 }
  0x96   :  { %3214 = vmatmul.mubr.msk.bf16.gmra.mxu0 %vm667_vm0, %v3269_v3  ;;  %1385 = vperm.xlu0 %3246, %v1311_v6   ;;  %v3942_v42 = vpop.permute.xlu1 %314  ;;  %v2538_v3 = vld [vmem:[%s4799_s7 + $0x10] sm:$0xff] }
  0x97   :  { %3217 = vmatprep.mubr.msk.bf16.mxu0 %vm667_vm0, %v3270_v4  ;;  %1390 = vperm.xlu1 %3247, %v1312_v7   ;;  %v2237_v4 = vld [vmem:[%s4798_s6 + $0x30] sm:$0xff]  ;;  %v2539_v7 = vld [vmem:[%s4799_s7 + $0x18] sm:$0xff] }
  0x99   :  { %v3946_v43 = vpop.permute.xlu0 %229 }
  0x9a   :  { %1455 = vperm.xlu0 %3246, %v1325_v9   ;;  %v3957_v47 = vpop.permute.xlu1 %234  ;;  %v2238_v9 = vld [vmem:[%s4798_s6 + $0x38] sm:$0xff] }
  0x9b   :  { %1460 = vperm.xlu1 %3247, %v1326_v10  }
  0x9d   :  { %v3965_v50 = vpop.permute.xlu0 %299 }
  0x9e   :  { %3218 = vmatmul.mubr.msk.bf16.gmra.mxu0 %vm667_vm0, %v3271_v12  ;;  %1375 = vperm.xlu0 %3246, %v1309_v14   ;;  %v3974_v53 = vpop.permute.xlu1 %304  ;;  %v2540_v12 = vld [vmem:[%s4799_s7 + $0x20] sm:$0xff] }
  0x9f   :  { %3221 = vmatprep.mubr.msk.bf16.mxu0 %vm667_vm0, %v3272_v13  ;;  %1380 = vperm.xlu1 %3247, %v1310_v15   ;;  %v2239_v13 = vld [vmem:[%s4798_s6 + $0x40] sm:$0xff] }
  0xa1   :  { %v3976_v54 = vpop.permute.xlu0 %219 }
  0xa2   :  { %1445 = vperm.xlu0 %3246, %v1323_v18   ;;  %v3984_v57 = vpop.permute.xlu1 %224  ;;  %v2541_v18 = vld [vmem:[%s4799_s7 + $0x28] sm:$0xff] }
  0xa3   :  { %1450 = vperm.xlu1 %3247, %v1324_v19   ;;  %v2240_v19 = vld [vmem:[%s4798_s6 + $0x48] sm:$0xff] }
  0xa5   :  { %v3992_v60 = vpop.permute.xlu0 %289 }
  0xa6   :  { %3222 = vmatmul.mubr.msk.bf16.gmra.mxu0 %vm667_vm0, %v3273_v20  ;;  %1365 = vperm.xlu0 %3246, %v1307_v23   ;;  %v4000_v0 = vpop.permute.xlu1 %294  ;;  %v2241_v23 = vld [vmem:[%s4798_s6 + $0x50] sm:$0xff] }
  0xa7   :  { %3225 = vmatprep.mubr.msk.bf16.mxu0 %vm667_vm0, %v3274_v21  ;;  %1370 = vperm.xlu1 %3247, %v1308_v24   ;;  %v2542_v21 = vld [vmem:[%s4799_s7 + $0x30] sm:$0xff] }
  0xa9   :  { %v4002_v1 = vpop.permute.xlu0 %209 }
  0xaa   :  { %1435 = vperm.xlu0 %3246, %v1321_v26   ;;  %v4010_v6 = vpop.permute.xlu1 %214  ;;  %v2543_v26 = vld [vmem:[%s4799_s7 + $0x38] sm:$0xff] }
  0xab   :  { %1440 = vperm.xlu1 %3247, %v1322_v27   ;;  %v2242_v27 = vld [vmem:[%s4798_s6 + $0x58] sm:$0xff] }
  0xad   :  { %v4018_v10 = vpop.permute.xlu0 %279 }
  0xae   :  { %3226 = vmatmul.mubr.msk.bf16.gmra.mxu0 %vm667_vm0, %v3275_v29  ;;  %1355 = vperm.xlu0 %3246, %v1305_v32   ;;  %v4026_v14 = vpop.permute.xlu1 %284 }
  0xaf   :  { %3229 = vmatprep.mubr.msk.bf16.mxu0 %vm667_vm0, %v3276_v30  ;;  %1360 = vperm.xlu1 %3247, %v1306_v33   ;;  %v2544_v30 = vld [vmem:[%s4799_s7 + $0x40] sm:$0xff] }
  0xb0   :  { %v3282_v33 = vld [vmem:[%s4800_s3 + $0x4] ss:$16 sps:$4 sm:$0xff]  }
  0xb1   :  { %v200_v15 = vpop.permute.xlu0 %199  ;;  %1845 = vmatprep.mubr.bf16.mxu1 %v3282_v33 }
  0xb2   :  { %1425 = vperm.xlu0 %3246, %v1319_v35   ;;  %v205_v20 = vpop.permute.xlu1 %204  ;;  %v2243_v35 = vld [vmem:[%s4798_s6 + $0x60] sm:$0xff] }
  0xb3   :  { %1430 = vperm.xlu1 %3247, %v1320_v36   ;;  %v2545_v36 = vld [vmem:[%s4799_s7 + $0x48] sm:$0xff] }
  0xb5   :  { %v4040_v24 = vpop.permute.xlu0 %269 }
  0xb6   :  { %3230 = vmatmul.mubr.msk.bf16.gmra.mxu0 %vm667_vm0, %v3277_v38  ;;  %1345 = vperm.xlu0 %3246, %v1303_v40   ;;  %4803 = vst [vmem:[#allocation3_spill] sm:$0xff] %v4040_v24  ;;  %v4048_v29 = vpop.permute.xlu1 %274  ;;  %v2244_v38 = vld [vmem:[%s4798_s6 + $0x68] sm:$0xff] }
  0xb7   :  { %3233 = vmatprep.mubr.msk.bf16.mxu0 %vm667_vm0, %v3278_v39  ;;  %1350 = vperm.xlu1 %3247, %v1304_v41   ;;  %v2546_v41 = vld [vmem:[%s4799_s7 + $0x50] sm:$0xff] }
  0xb9   :  { %v190_v32 = vpop.permute.xlu0 %189 }
  0xba   :  { %1415 = vperm.xlu0 %3246, %v1317_v44   ;;  %v195_v39 = vpop.permute.xlu1 %194  ;;  %v2245_v44 = vld [vmem:[%s4798_s6 + $0x70] sm:$0xff] }
  0xbb   :  { %1420 = vperm.xlu1 %3247, %v1318_v45  }
  0xbd   :  { %v4065_v40 = vpop.permute.xlu0 %499 }
  0xbe   :  { %3234 = vmatmul.mubr.msk.bf16.gmra.mxu0 %vm667_vm0, %v3279_v46  ;;  %1335 = vperm.xlu0 %3246, %v1301_v48   ;;  %4804 = vst [vmem:[#allocation4_spill] sm:$0xff] %v4065_v40  ;;  %v4073_v45 = vpop.permute.xlu1 %504  ;;  %v2547_v46 = vld [vmem:[%s4799_s7 + $0x58] sm:$0xff] }
  0xbf   :  { %1340 = vperm.xlu1 %3247, %v1302_v49   ;;  %4805 = vst [vmem:[#allocation5_spill] sm:$0xff] %v4073_v45  ;;  %v2246_v48 = vld [vmem:[%s4798_s6 + $0x78] sm:$0xff] }
  0xc1   :  { %v4081_v49 = vpop.permute.xlu0 %419 }
  0xc2   :  { %2249 = vperm.xlu0 %3246, %v2231_v51   ;;  %4806 = vst [vmem:[#allocation6_spill] sm:$0xff] %v4081_v49  ;;  %v4083_v51 = vpop.permute.xlu1 %424 }
  0xc3   :  { %2254 = vperm.xlu1 %3247, %v2232_v52   ;;  %4807 = vst [vmem:[#allocation7_spill] sm:$0xff] %v4083_v51  ;;  %v2548_v52 = vld [vmem:[%s4799_s7 + $0x60] sm:$0xff] }
  0xc6   :  { %2259 = vperm.xlu0 %3246, %v2233_v55   ;;  %v2549_v55 = vld [vmem:[%s4799_s7 + $0x68] sm:$0xff] }
  0xc7   :  { %2264 = vperm.xlu1 %3247, %v2234_v56   ;;  %v4091_v56 = vpop.permute.xlu0 %489 }
  0xc8   :  { %4808 = vst [vmem:[#allocation8_spill] sm:$0xff] %v4091_v56 }
  0xca   :  { %2269 = vperm.xlu0 %3246, %v2235_v58   ;;  %v2550_v58 = vld [vmem:[%s4799_s7 + $0x70] sm:$0xff] }
  0xcb   :  { %2274 = vperm.xlu1 %3247, %v2236_v59   ;;  %v2551_v59 = vld [vmem:[%s4799_s7 + $0x78] sm:$0xff] }
  0xce   :  { %2554 = vperm.xlu0 %3246, %v2536_v61   ;;  %v4099_v61 = vpop.permute.xlu1 %494 }
  0xcf   :  { %2559 = vperm.xlu1 %3247, %v2537_v62   ;;  %4809 = vst [vmem:[#allocation9_spill] sm:$0xff] %v4099_v61  ;;  %v4101_v62 = vpop.permute.xlu0 %409 }
  0xd0   :  { %4810 = vst [vmem:[#allocation10_spill] sm:$0xff] %v4101_v62 }
  0xd2   :  { %2564 = vperm.xlu0 %3246, %v2538_v3   ;;  %v2669_v3 = vld [vmem:[#allocation2] sm:$0x1] }
  0xd3   :  { %2279 = vperm.xlu1 %3247, %v2237_v4   ;;  %v4103_v4 = vpop.permute.xlu1 %414 }
  0xd4   :  { %4811 = vst [vmem:[#allocation11_spill] sm:$0xff] %v4103_v4 }
  0xd6   :  { %2569 = vperm.xlu0 %3246, %v2539_v7   ;;  %v4105_v7 = vpop.permute.xlu0 %479 }
  0xd7   :  { %2284 = vperm.xlu1 %3247, %v2238_v9   ;;  %4812 = vst [vmem:[#allocation12_spill] sm:$0xff] %v4105_v7 }
  0xda   :  { %2574 = vperm.xlu0 %3246, %v2540_v12  }
  0xdb   :  { %2289 = vperm.xlu1 %3247, %v2239_v13  }
  0xde   :  { %2579 = vperm.xlu0 %3246, %v2541_v18  }
  0xdf   :  { %2294 = vperm.xlu1 %3247, %v2240_v19   ;;  %v4107_v19 = vpop.permute.xlu1 %484 }
  0xe0   :  { %4813 = vst [vmem:[#allocation13_spill] sm:$0xff] %v4107_v19 }
  0xe2   :  { %2584 = vperm.xlu0 %3246, %v2542_v21  }
  0xe3   :  { %2299 = vperm.xlu1 %3247, %v2241_v23  }
  0xe6   :  { %2589 = vperm.xlu0 %3246, %v2543_v26  }
  0xe7   :  { %2304 = vperm.xlu1 %3247, %v2242_v27   ;;  %v4109_v27 = vpop.permute.xlu0 %399 }
  0xe8   :  { %4814 = vst [vmem:[#allocation14_spill] sm:$0xff] %v4109_v27 }
  0xea   :  { %2594 = vperm.xlu0 %3246, %v2544_v30  }
  0xeb   :  { %2309 = vperm.xlu1 %3247, %v2243_v35  }
  0xee   :  { %2599 = vperm.xlu0 %3246, %v2545_v36  }
  0xef   :  { %2314 = vperm.xlu1 %3247, %v2244_v38  }
  0xf2   :  { %2604 = vperm.xlu0 %3246, %v2546_v41  }
  0xf3   :  { %2319 = vperm.xlu1 %3247, %v2245_v44  }
  0xf6   :  { %2609 = vperm.xlu0 %3246, %v2547_v46  }
  0xf7   :  { %2324 = vperm.xlu1 %3247, %v2246_v48  }
  0xfa   :  { %2614 = vperm.xlu0 %3246, %v2548_v52  }
  0xfb   :  { %2619 = vperm.xlu1 %3247, %v2549_v55  }
  0xfe   :  { %2624 = vperm.xlu0 %3246, %v2550_v58  }
  0xff   :  { %2629 = vperm.xlu1 %3247, %v2551_v59   ;;  %v4117_v59 = vpop.permute.xlu0 %469 }
 0x100   :  { %4817 = vst [vmem:[#allocation17_spill] sm:$0xff] %v4117_v59 }
 0x102   :  { %2672 = vperm.xlu0 %3246, %v2669_v3  }
 0x106   :  { %v3175_v9 = vpop.f32.mrf.mxu0 }
 0x107   :  { %v831_v12 = vadd.f32 %v3175_v9, %v200_v15  ;;  %v4112_v15 = vpop.permute.xlu1 %404 }
 0x108   :  { %v822_v13 = vpop.f32.mrf.mxu0  ;;  %4815 = vst [vmem:[#allocation15_spill] sm:$0xff] %v4112_v15 }
 0x109   :  { %v823_v18 = vadd.f32 %v822_v13, %v190_v32  ;;  %v1079_v23 = vmul.f32 0.2, %v831_v12 }
 0x10a   :  { %v3176_v21 = vpop.f32.mrf.mxu0 }
 0x10b   :  { %v834_v26 = vadd.f32 %v3176_v21, %v205_v20  ;;  %v1077_v33 = vmul.f32 0.2, %v823_v18  ;;  %v1143_v41 = vmax.f32 %v831_v12, %v1079_v23 }
 0x10c   :  { %v825_v30 = vpop.f32.mrf.mxu0 }
 0x10d   :  { %v1080_v35 = vmul.f32 0.2, %v834_v26  ;;  %v826_v36 = vadd.f32 %v825_v30, %v195_v39  ;;  %v1141_v52 = vmax.f32 %v823_v18, %v1077_v33 }
 0x10e   :  { %v3179_v38 = vpop.f32.mrf.mxu0 }
 0x10f   :  { %v1144_v44 = vmax.f32 %v834_v26, %v1080_v35  ;;  %v1078_v46 = vmul.f32 0.2, %v826_v36  ;;  %v847_v48 = vadd.f32 %v3179_v38, %v3976_v54  ;;  %v4123_v26 = vpop.permute.xlu1 %474  ;;  %v4125_v35 = vpop.permute.xlu0 %389 }
 0x110   :  { %v838_v32 = vpop.f32.mrf.mxu0  ;;  %4819 = vst [vmem:[#allocation19_spill] sm:$0xff] %v4123_v26  ;;  %4820 = vst [vmem:[#allocation20_spill] sm:$0xff] %v4125_v35 }
 0x111   :  { %v1142_v55 = vmax.f32 %v826_v36, %v1078_v46  ;;  %v839_v58 = vadd.f32 %v838_v32, %v4002_v1  ;;  %v4115_v20 = vpack.c.bf16 %v1144_v44, %v1143_v41  ;;  %v1083_v9 = vmul.f32 0.2, %v847_v48 }
 0x112   :  { %v3180_v3 = vpop.f32.mrf.mxu0 }
 0x113   :  { %4816 = vst [vmem:[#allocation16_spill] sm:$0xff] %v4115_v20  ;;  %v850_v39 = vadd.f32 %v3180_v3, %v3984_v57  ;;  %v4120_v12 = vpack.c.bf16 %v1142_v55, %v1141_v52  ;;  %v1081_v21 = vmul.f32 0.2, %v839_v58  ;;  %v1147_v30 = vmax.f32 %v847_v48, %v1083_v9  ;;  %v4131_v32 = vpop.permute.xlu1 %394 }
 0x114   :  { %v841_v13 = vpop.f32.mrf.mxu0  ;;  %4823 = vst [vmem:[#allocation23_spill] sm:$0xff] %v4131_v32 }
 0x115   :  { %4818 = vst [vmem:[#allocation18_spill] sm:$0xff] %v4120_v12  ;;  %v1084_v54 = vmul.f32 0.2, %v850_v39  ;;  %v842_v23 = vadd.f32 %v841_v13, %v4010_v6  ;;  %v1145_v38 = vmax.f32 %v839_v58, %v1081_v21  ;;  %v4133_v6 = vpop.permute.xlu0 %459 }
 0x116   :  { %v3183_v18 = vpop.f32.mrf.mxu0  ;;  %4824 = vst [vmem:[#allocation24_spill] sm:$0xff] %v4133_v6 }
 0x117   :  { %v1148_v1 = vmax.f32 %v850_v39, %v1084_v54  ;;  %v1082_v33 = vmul.f32 0.2, %v842_v23  ;;  %v4135_v48 = vpop.permute.xlu1 %464 }
 0x118   :  { %v854_v36 = vpop.f32.mrf.mxu0  ;;  %4825 = vst [vmem:[#allocation25_spill] sm:$0xff] %v4135_v48 }
 0x119   :  { %v1146_v41 = vmax.f32 %v842_v23, %v1082_v33  ;;  %v4127_v44 = vpack.c.bf16 %v1148_v1, %v1147_v30  ;;  %v4137_v39 = vpop.permute.xlu0 %379 }
 0x11a   :  { %v3184_v57 = vpop.f32.mrf.mxu0 }
 0x11b   :  { %4821 = vst [vmem:[#allocation21_spill] sm:$0xff] %v4127_v44  ;;  %v4129_v46 = vpack.c.bf16 %v1146_v41, %v1145_v38  ;;  %v4141_v21 = vpop.permute.xlu1 %384  ;;  %v4171_v62 = vadd.f32 %v3184_v57, %v3920_v34 }
 0x11c   :  { %v857_v52 = vpop.f32.mrf.mxu0 }
 0x11d   :  { %4822 = vst [vmem:[#allocation22_spill] sm:$0xff] %v4129_v46  ;;  %v4145_v23 = vpop.permute.xlu0 %449  ;;  %v4186_v34 = vmul.f32 0.2, %v4171_v62 }
 0x11e   :  { %v3187_v55 = vpop.f32.mrf.mxu0  ;;  %4827 = vst [vmem:[#allocation27_spill] sm:$0xff] %v4145_v23 }
 0x11f   :  { %v4151_v33 = vpop.permute.xlu1 %454 }
 0x120   :  { %v870_v3 = vpop.f32.mrf.mxu0  ;;  %4828 = vst [vmem:[#allocation28_spill] sm:$0xff] %v4151_v33  ;;  %v4168_v33 = vadd.f32 %v3183_v18, %v3910_v31  ;;  %v879_v31 = vadd.f32 %v3187_v55, %v3826_v2 }
 0x121   :  { %v4155_v41 = vpop.permute.xlu0 %369 }
 0x122   :  { %v3188_v9 = vpop.f32.mrf.mxu0  ;;  %v4175_v4 = vmul.f32 0.2, %v4168_v33 }
 0x123   :  { %v4159_v48 = vpop.permute.xlu1 %374  ;;  %v882_v45 = vadd.f32 %v3188_v9, %v3844_v8  ;;  %v871_v9 = vadd.f32 %v870_v3, %v3870_v17 }
 0x124   :  { %v873_v13 = vpop.f32.mrf.mxu0 }
 0x125   :  { %v4163_v59 = vpop.permute.xlu0 %439  ;;  %v4183_v18 = vadd.f32 %v873_v13, %v3884_v22  ;;  %v4200_v13 = vadd.f32 %v857_v52, %v3957_v47  ;;  %v1089_v51 = vmul.f32 0.2, %v871_v9 }
 0x126   :  { %v4139_v58 = vpop.f32.mrf.mxu0  ;;  %4829 = vst [vmem:[#allocation29_spill] sm:$0xff] %v4163_v59  ;;  %v4178_v59 = vadd.f32 %v854_v36, %v3946_v43  ;;  %v1092_v43 = vmul.f32 0.2, %v882_v45 }
 0x127   :  { %v4165_v26 = vpop.permute.xlu1 %444 }
 0x128   :  { %v4143_v54 = vpop.f32.mrf.mxu0  ;;  %4830 = vst [vmem:[#allocation30_spill] sm:$0xff] %v4165_v26  ;;  %v4196_v22 = vmul.f32 0.2, %v4178_v59 }
 0x129   :  { %4826 = vst [vmem:[#allocation26_spill] sm:$0xff] %v4143_v54  ;;  %v360_v61 = vpop.permute.xlu0 %359 }
 0x12a   :  { %v4147_v30 = vpop.f32.mrf.mxu0 }
 0x12b   :  { %v365_v56 = vpop.permute.xlu1 %364 }
 0x12c   :  { %v4149_v1 = vpop.f32.mrf.mxu0 }
 0x12d   :  { %v4189_v57 = vpop.permute.xlu0 %429 }
 0x12e   :  { %v4153_v38 = vpop.f32.mrf.mxu0  ;;  %4831 = vst [vmem:[#allocation31_spill] sm:$0xff] %v4189_v57 }
 0x12f   :  { %v4207_v40 = vpop.permute.xlu1 %434 }
 0x130   :  { %v4157_v6 = vpop.f32.mrf.mxu0  ;;  %4832 = vst [vmem:[#allocation32_spill] sm:$0xff] %v4207_v40 }
 0x131   :  { %v350_v46 = vpop.permute.xlu0 %349 }
 0x132   :  { %v3196_v35 = vpop.f32.mrf.mxu0 }
 0x134   :  { %v4161_v32 = vpop.f32.mrf.mxu0 }
 0x136   :  { %v3199_v23 = vpop.f32.mrf.mxu0 }
 0x137   :  { %v927_v17 = vadd.f32 %v3199_v23, %v3892_v25 }
 0x138   :  { %v918_v27 = vpop.f32.mrf.mxu0 }
 0x139   :  { %v1103_v54 = vmul.f32 0.2, %v927_v17 }
 0x13a   :  { %v3200_v15 = vpop.f32.mrf.mxu0 }
 0x13b   :  { %v930_v36 = vadd.f32 %v3200_v15, %v3902_v28 }
 0x13c   :  { %v921_v7 = vpop.f32.mrf.mxu0 }
 0x13d   :  { %v4210_v47 = vadd.f32 %v921_v7, %v3942_v42  ;;  %v4215_v42 = vadd.f32 %v3196_v35, %v3974_v53 }
 0x13e   :  { %v3203_v19 = vpop.f32.mrf.mxu0 }
 0x13f   :  { %v943_v26 = vadd.f32 %v3203_v19, %v3816_v63 }
 0x140   :  { %v934_v49 = vpop.f32.mrf.mxu0 }
 0x141   :  { %v935_v8 = vadd.f32 %v934_v49, %v3852_v11  ;;  %v1107_v19 = vmul.f32 0.2, %v943_v26  ;;  %v1091_v11 = vmul.f32 0.2, %v879_v31  ;;  %v1090_v49 = vmul.f32 0.2, %v4183_v18 }
 0x142   :  { %v3204_v63 = vpop.f32.mrf.mxu0 }
 0x143   :  { %v946_v55 = vadd.f32 %v3204_v63, %v3834_v5  ;;  %v1105_v15 = vmul.f32 0.2, %v935_v8  ;;  %v1156_v5 = vmax.f32 %v882_v45, %v1092_v43  ;;  %v1104_v63 = vmul.f32 0.2, %v930_v36 }
 0x144   :  { %v937_v3 = vpop.f32.mrf.mxu0  ;;  %v1171_v25 = vmax.f32 %v943_v26, %v1107_v19  ;;  %v1155_v44 = vmax.f32 %v879_v31, %v1091_v11  ;;  %v1154_v28 = vmax.f32 %v4183_v18, %v1090_v49  ;;  %v1153_v19 = vmax.f32 %v871_v9, %v1089_v51  ;;  %v355_v11 = vpop.permute.xlu1 %354 }
 0x145   :  { %v1108_v2 = vmul.f32 0.2, %v946_v55  ;;  %v938_v57 = vadd.f32 %v937_v3, %v3866_v16  ;;  %v919_v16 = vadd.f32 %v918_v27, %v3928_v37  ;;  %v1169_v40 = vmax.f32 %v935_v8, %v1105_v15 }
 0x146   :  { %v3207_v52 = vpop.f32.mrf.mxu0  ;;  %v1168_v7 = vmax.f32 %v930_v36, %v1104_v63  ;;  %v1086_v37 = vmul.f32 0.2, %v4200_v13  ;;  %v911_v27 = vadd.f32 %v4153_v38, %v3965_v50  ;;  %v1100_v51 = vmul.f32 0.2, %v4215_v42 }
 0x147   :  { %v1106_v12 = vmul.f32 0.2, %v938_v57  ;;  %v959_v20 = vadd.f32 %v3207_v52, %v360_v61  ;;  %v1172_v23 = vmax.f32 %v946_v55, %v1108_v2  ;;  %v1102_v61 = vmul.f32 0.2, %v4210_v47 }
 0x148   :  { %v950_v3 = vpop.f32.mrf.mxu0  ;;  %v1276_v2 = vpack.c.bf16 %v1156_v5, %v1155_v44  ;;  %v1275_v44 = vpack.c.bf16 %v1154_v28, %v1153_v19  ;;  %v1150_v49 = vmax.f32 %v4200_v13, %v1086_v37  ;;  %v903_v28 = vadd.f32 %v4157_v6, %v3992_v60  ;;  %v4835_v19 = vld [vmem:[#allocation3_spill] sm:$0xff] }
 0x149   :  { %v1170_v24 = vmax.f32 %v938_v57, %v1106_v12  ;;  %v951_v45 = vadd.f32 %v950_v3, %v350_v46  ;;  %v1284_v43 = vpack.c.bf16 %v1172_v23, %v1171_v25  ;;  %v1111_v31 = vmul.f32 0.2, %v959_v20 }
 0x14a   :  { %v3208_v26 = vpop.f32.mrf.mxu0  ;;  %v1167_v12 = vmax.f32 %v927_v17, %v1103_v54  ;;  %v1101_v46 = vmul.f32 0.2, %v919_v16  ;;  %v1099_v17 = vmul.f32 0.2, %v911_v27  ;;  %v4833_v60 = vmax.f32 %v4168_v33, %v4175_v4 }
 0x14b   :  { %v962_v55 = vadd.f32 %v3208_v26, %v365_v56  ;;  %2869 = vmatprep.subr.bf16.mxu1 %v1284_v43  ;;  %v1283_v18 = vpack.c.bf16 %v1170_v24, %v1169_v40  ;;  %v1109_v35 = vmul.f32 0.2, %v951_v45  ;;  %v906_v24 = vadd.f32 %v4161_v32, %v4000_v0 }
 0x14c   :  { %v953_v53 = vpop.f32.mrf.mxu0  ;;  %2870 = vmatpush3.bf16.msra.mxu1 %v1276_v2  ;;  %v1166_v40 = vmax.f32 %v4210_v47, %v1102_v61  ;;  %v1282_v9 = vpack.c.bf16 %v1168_v7, %v1167_v12  ;;  %v1175_v36 = vmax.f32 %v959_v20, %v1111_v31  ;;  %v1165_v15 = vmax.f32 %v919_v16, %v1101_v46  ;;  %v4836_v31 = vld [vmem:[#allocation26_spill] sm:$0xff] }
 0x14d   :  { %v1112_v8 = vmul.f32 0.2, %v962_v55  ;;  %v954_v57 = vadd.f32 %v953_v53, %v355_v11  ;;  %2871 = vmatprep.subr.bf16.mxu1 %v1283_v18  ;;  %v1173_v63 = vmax.f32 %v951_v45, %v1109_v35  ;;  %v898_v20 = vadd.f32 %v4147_v30, %v4026_v14 }
 0x14e   :  { %v3211_v56 = vpop.f32.mrf.mxu0  ;;  %v1098_v13 = vmul.f32 0.2, %v906_v24  ;;  %v4834_v6 = vmax.f32 %v4171_v62, %v4186_v34  ;;  %v1281_v3 = vpack.c.bf16 %v1166_v40, %v1165_v15  ;;  %v1149_v14 = vmax.f32 %v4178_v59, %v4196_v22 }
 0x14f   :  { %v1176_v50 = vmax.f32 %v962_v55, %v1112_v8  ;;  %v1110_v54 = vmul.f32 0.2, %v954_v57  ;;  %v975_v38 = vadd.f32 %v3211_v56, %v4137_v39  ;;  %v1164_v39 = vmax.f32 %v4215_v42, %v1100_v51  ;;  %v4837_v8 = vld [vmem:[#allocation21_spill] sm:$0xff] }
 0x150   :  { %v966_v5 = vpop.f32.mrf.mxu0  ;;  %2872 = vmatpush3.bf16.msra.mxu1 %v1275_v44  ;;  %v1274_v25 = vpack.c.bf16 %v4834_v6, %v4833_v60  ;;  %v895_v30 = vadd.f32 %v4139_v58, %v4018_v10  ;;  %v1163_v45 = vmax.f32 %v911_v27, %v1099_v17  ;;  %v1097_v4 = vmul.f32 0.2, %v903_v28 }
 0x151   :  { %v4229_v0 = vpack.c.bf16 %v1176_v50, %v1175_v36  ;;  %v1174_v32 = vmax.f32 %v954_v57, %v1110_v54  ;;  %v967_v47 = vadd.f32 %v966_v5, %v4155_v41  ;;  %2873 = vmatprep.subr.bf16.mxu1 %v1282_v9  ;;  %v1115_v16 = vmul.f32 0.2, %v975_v38  ;;  %v4838_v9 = vld [vmem:[#allocation22_spill] sm:$0xff] }
 0x152   :  { %v3212_v52 = vpop.f32.mrf.mxu0  ;;  %v1096_v34 = vmul.f32 0.2, %v898_v20  ;;  %v1162_v7 = vmax.f32 %v906_v24, %v1098_v13  ;;  %v1273_v59 = vpack.c.bf16 %v1150_v49, %v1149_v14  ;;  %v1280_v58 = vpack.c.bf16 %v1164_v39, %v1163_v45  ;;  %v4839_v49 = vld [vmem:[#allocation16_spill] sm:$0xff]  ;;  %v4840_v5 = vld [vmem:[#allocation18_spill] sm:$0xff]  ;;  %v4841_v45 = vld [vmem:[#allocation7_spill] sm:$0xff] }
 0x153   :  { %v4241_v23 = vpack.c.bf16 %v1174_v32, %v1173_v63  ;;  %v978_v41 = vadd.f32 %v3212_v52, %v4141_v21  ;;  %v1113_v33 = vmul.f32 0.2, %v967_v47  ;;  %v890_v21 = vadd.f32 %v4149_v1, %v4048_v29  ;;  %v3283_v63 = vld [vmem:[%s4800_s3 + $0x24] ss:$16 sps:$4 sm:$0xff]   ;;  %v3285_v39 = vld [vmem:[%s4800_s3 + $0x20] ss:$16 sps:$4 sm:$0xff]  }
 0x154   :  { %v969_v43 = vpop.f32.mrf.mxu0  ;;  %2874 = vmatpush3.bf16.msra.mxu1 %v1274_v25  ;;  %v1179_v22 = vmax.f32 %v975_v38, %v1115_v16  ;;  %v1095_v2 = vmul.f32 0.2, %v895_v30  ;;  %v887_v55 = vadd.f32 %v4836_v31, %v4835_v19  ;;  %v1160_v27 = vmax.f32 %v898_v20, %v1096_v34  ;;  %v3286_v52 = vld [vmem:[%s4800_s3 + $0x44] ss:$16 sps:$4 sm:$0xff]   ;;  %v3288_v16 = vld [vmem:[%s4800_s3 + $0x40] ss:$16 sps:$4 sm:$0xff]  }
 0x155   :  { %v1116_v42 = vmul.f32 0.2, %v978_v41  ;;  %v970_v62 = vadd.f32 %v969_v43, %v4159_v48  ;;  %2875 = vmatprep.subr.bf16.mxu1 %v1281_v3  ;;  %v1161_v48 = vmax.f32 %v903_v28, %v1097_v4  ;;  %v1177_v11 = vmax.f32 %v967_v47, %v1113_v33  ;;  %v3280_v28 = vld [vmem:[%s4800_s3] ss:$16 sps:$4 sm:$0xff]   ;;  %v3289_v3 = vld [vmem:[%s4800_s3 + $0x64] ss:$16 sps:$4 sm:$0xff]  }
 0x156   :  { %v4251_v61 = vpop.f32.mrf.mxu0  ;;  %v1094_v12 = vmul.f32 0.2, %v890_v21  ;;  %v1159_v57 = vmax.f32 %v895_v30, %v1095_v2  ;;  %v1093_v44 = vmul.f32 0.2, %v887_v55  ;;  %v4842_v33 = vld [vmem:[#allocation4_spill] sm:$0xff]  ;;  %v4843_v34 = vld [vmem:[#allocation6_spill] sm:$0xff] }
 0x157   :  { %v1180_v26 = vmax.f32 %v978_v41, %v1116_v42  ;;  %v1114_v10 = vmul.f32 0.2, %v970_v62  ;;  %v1279_v53 = vpack.c.bf16 %v1162_v7, %v1161_v48  ;;  %v4846_v19 = vld [vmem:[#allocation13_spill] sm:$0xff] }
 0x158   :  { %v4255_v18 = vpop.f32.mrf.mxu0  ;;  %2876 = vmatpush3.bf16.msra.mxu1 %v1273_v59  ;;  %v1158_v24 = vmax.f32 %v890_v21, %v1094_v12  ;;  %v1278_v40 = vpack.c.bf16 %v1160_v27, %v1159_v57  ;;  %v1157_v36 = vmax.f32 %v887_v55, %v1093_v44  ;;  %v3292_v59 = vld [vmem:[%s4800_s3 + $0x84] ss:$16 sps:$4 sm:$0xff]   ;;  %v4848_v12 = vld [vmem:[#allocation10_spill] sm:$0xff] }
 0x159   :  { %v4257_v37 = vpack.c.bf16 %v1180_v26, %v1179_v22  ;;  %v1178_v29 = vmax.f32 %v970_v62, %v1114_v10  ;;  %2877 = vmatprep.subr.bf16.mxu1 %v1280_v58  ;;  %v3291_v62 = vld [vmem:[%s4800_s3 + $0x60] ss:$16 sps:$4 sm:$0xff]  }
 0x15a   :  { %v4259_v1 = vpop.f32.mrf.mxu0  ;;  %v1277_v54 = vpack.c.bf16 %v1158_v24, %v1157_v36  ;;  %v4844_v22 = vld [vmem:[#allocation8_spill] sm:$0xff]  ;;  %v4845_v58 = vld [vmem:[#allocation11_spill] sm:$0xff] }
 0x15b   :  { %v4261_v46 = vpack.c.bf16 %v1178_v29, %v1177_v11  ;;  %v4847_v11 = vld [vmem:[#allocation5_spill] sm:$0xff]  ;;  %v4851_v36 = vld [vmem:[#allocation15_spill] sm:$0xff] }
 0x15c   :  { %v4263_v35 = vpop.f32.mrf.mxu0  ;;  %2878 = vmatpush3.bf16.msra.mxu1 %v4837_v8  ;;  %v4849_v8 = vld [vmem:[#allocation12_spill] sm:$0xff] }
 0x15d   :  { %2879 = vmatprep.subr.bf16.mxu1 %v1279_v53 }
 0x15e   :  { %v3219_v51 = vpop.f32.mrf.mxu0 }
 0x15f   :  { %v1007_v21 = vadd.f32 %v3219_v51, %v4843_v34  ;;  %v4855_v34 = vld [vmem:[#allocation23_spill] sm:$0xff] }
 0x160   :  { %v998_v56 = vpop.f32.mrf.mxu0  ;;  %2880 = vmatpush3.bf16.msra.mxu1 %v4838_v9 }
 0x161   :  { %2881 = vmatprep.subr.bf16.mxu1 %v1278_v40  ;;  %v1123_v27 = vmul.f32 0.2, %v1007_v21  ;;  %v999_v53 = vadd.f32 %v998_v56, %v4848_v12  ;;  %v4850_v40 = vld [vmem:[#allocation9_spill] sm:$0xff] }
 0x162   :  { %v3220_v50 = vpop.f32.mrf.mxu0  ;;  %v3294_v56 = vld [vmem:[%s4800_s3 + $0x80] ss:$16 sps:$4 sm:$0xff]  }
 0x163   :  { %v1010_v43 = vadd.f32 %v3220_v50, %v4841_v45  ;;  %v994_v50 = vadd.f32 %v4259_v1, %v4851_v36  ;;  %v3295_v1 = vld [vmem:[%s4800_s3 + $0xa4] ss:$16 sps:$4 sm:$0xff]  }
 0x164   :  { %v1001_v38 = vpop.f32.mrf.mxu0  ;;  %2882 = vmatpush3.bf16.msra.mxu1 %v4839_v49 }
 0x165   :  { %2883 = vmatprep.subr.bf16.mxu1 %v1277_v54  ;;  %v1124_v10 = vmul.f32 0.2, %v1010_v43  ;;  %v1002_v2 = vadd.f32 %v1001_v38, %v4845_v58 }
 0x166   :  { %v4268_v17 = vpop.f32.mrf.mxu0 }
 0x167   :  { %v1188_v54 = vmax.f32 %v1010_v43, %v1124_v10  ;;  %v1122_v38 = vmul.f32 0.2, %v1002_v2  ;;  %v4854_v43 = vld [vmem:[#allocation17_spill] sm:$0xff] }
 0x168   :  { %v4273_v15 = vpop.f32.mrf.mxu0  ;;  %2884 = vmatpush3.bf16.msra.mxu1 %v4840_v5  ;;  %v4856_v10 = vld [vmem:[#allocation25_spill] sm:$0xff] }
 0x16a   :  { %v4279_v32 = vpop.f32.mrf.mxu0 }
 0x16b   :  { %1846 = vmatmul.mubr.bf16.vlgmr.msra.gmra.mxu1 %v3280_v28  ;;  %v4852_v28 = vld [vmem:[#allocation19_spill] sm:$0xff] }
 0x16c   :  { %v4281_v47 = vpop.f32.mrf.mxu0  ;;  %1853 = vmatprep.mubr.bf16.mxu1 %v3283_v63 }
 0x16e   :  { %v4283_v20 = vpop.f32.mrf.mxu0 }
 0x170   :  { %v4288_v13 = vpop.f32.mrf.mxu0 }
 0x172   :  { %v3228_v60 = vpop.f32.mrf.mxu0 }
 0x173   :  { %1854 = vmatmul.mubr.bf16.gmra.mxu1 %v3285_v39 }
 0x174   :  { %v4293_v6 = vpop.f32.mrf.mxu0  ;;  %1861 = vmatprep.mubr.bf16.mxu1 %v3286_v52 }
 0x176   :  { %v3231_v25 = vpop.f32.mrf.mxu0 }
 0x177   :  { %v1055_v57 = vadd.f32 %v3231_v25, %v4849_v8  ;;  %v4853_v25 = vld [vmem:[#allocation14_spill] sm:$0xff]  ;;  %v4859_v8 = vld [vmem:[#allocation28_spill] sm:$0xff] }
 0x178   :  { %v1046_v41 = vpop.f32.mrf.mxu0 }
 0x179   :  { %v1135_v45 = vmul.f32 0.2, %v1055_v57 }
 0x17a   :  { %v3232_v14 = vpop.f32.mrf.mxu0 }
 0x17b   :  { %1862 = vmatmul.mubr.bf16.gmra.mxu1 %v3288_v16  ;;  %v1058_v31 = vadd.f32 %v3232_v14, %v4846_v19  ;;  %v991_v16 = vadd.f32 %v4251_v61, %v4853_v25  ;;  %v1121_v14 = vmul.f32 0.2, %v999_v53  ;;  %v1042_v61 = vadd.f32 %v3228_v60, %v4856_v10 }
 0x17c   :  { %v1049_v30 = vpop.f32.mrf.mxu0  ;;  %1869 = vmatprep.mubr.bf16.mxu1 %v3289_v3  ;;  %v1187_v3 = vmax.f32 %v1007_v21, %v1123_v27 }
 0x17d   :  { %v1136_v49 = vmul.f32 0.2, %v1058_v31  ;;  %v1050_v5 = vadd.f32 %v1049_v30, %v4852_v28  ;;  %v1132_v12 = vmul.f32 0.2, %v1042_v61 }
 0x17e   :  { %v3235_v4 = vpop.f32.mrf.mxu0 }
 0x17f   :  { %v1071_v42 = vadd.f32 %v3235_v4, %v4842_v33  ;;  %v1047_v4 = vadd.f32 %v1046_v41, %v4854_v43  ;;  %v1200_v21 = vmax.f32 %v1058_v31, %v1136_v49  ;;  %v1134_v58 = vmul.f32 0.2, %v1050_v5  ;;  %v3300_v43 = vld [vmem:[%s4800_s3 + $0xc0] ss:$16 sps:$4 sm:$0xff]  }
 0x180   :  { %v1062_v7 = vpop.f32.mrf.mxu0  ;;  %v1196_v28 = vmax.f32 %v1042_v61, %v1132_v12  ;;  %v3303_v61 = vld [vmem:[%s4800_s3 + $0xe0] ss:$16 sps:$4 sm:$0xff]   ;;  %v3328_v12 = vld [vmem:[%s4800_s3 + $0x8] ss:$16 sps:$4 sm:$0xff]  }
 0x181   :  { %v1063_v26 = vadd.f32 %v1062_v7, %v4844_v22  ;;  %v1139_v48 = vmul.f32 0.2, %v1071_v42  ;;  %v986_v7 = vadd.f32 %v4263_v35, %v4855_v34  ;;  %v1186_v22 = vmax.f32 %v1002_v2, %v1122_v38  ;;  %v4861_v38 = vld [vmem:[#allocation30_spill] sm:$0xff] }
 0x182   :  { %v3236_v55 = vpop.f32.mrf.mxu0  ;;  %v1199_v35 = vmax.f32 %v1055_v57, %v1135_v45  ;;  %v1133_v27 = vmul.f32 0.2, %v1047_v4  ;;  %v1026_v49 = vadd.f32 %v4279_v32, %v4861_v38  ;;  %v3352_v38 = vld [vmem:[%s4800_s3 + $0x10c] ss:$16 sps:$4 sm:$0xff]  }
 0x183   :  { %v1074_v29 = vadd.f32 %v3236_v55, %v4847_v11  ;;  %1870 = vmatmul.mubr.bf16.gmra.mxu1 %v3291_v62  ;;  %v1137_v51 = vmul.f32 0.2, %v1063_v26  ;;  %v1203_v63 = vmax.f32 %v1071_v42, %v1139_v48  ;;  %v1120_v62 = vmul.f32 0.2, %v994_v50  ;;  %v4857_v48 = vld [vmem:[#allocation20_spill] sm:$0xff] }
 0x184   :  { %v1065_v44 = vpop.f32.mrf.mxu0  ;;  %1877 = vmatprep.mubr.bf16.mxu1 %v3292_v59  ;;  %v1292_v59 = vpack.c.bf16 %v1188_v54, %v1187_v3  ;;  %v1119_v55 = vmul.f32 0.2, %v991_v16  ;;  %v983_v41 = vadd.f32 %v4255_v18, %v4857_v48  ;;  %v4858_v11 = vld [vmem:[#allocation24_spill] sm:$0xff]  ;;  %v1118_v60 = vmul.f32 0.2, %v986_v7 }
 0x185   :  { %v1140_v24 = vmul.f32 0.2, %v1074_v29  ;;  %v1066_v9 = vadd.f32 %v1065_v44, %v4850_v40  ;;  %v1201_v30 = vmax.f32 %v1063_v26, %v1137_v51  ;;  %v1185_v26 = vmax.f32 %v999_v53, %v1121_v14  ;;  %v3297_v18 = vld [vmem:[%s4800_s3 + $0xa0] ss:$16 sps:$4 sm:$0xff]  }
 0x186   :  { %v1184_v2 = vmax.f32 %v994_v50, %v1120_v62  ;;  %v1034_v44 = vadd.f32 %v4293_v6, %v4859_v8  ;;  %v1198_v51 = vmax.f32 %v1050_v5, %v1134_v58  ;;  %v1183_v53 = vmax.f32 %v991_v16, %v1119_v55  ;;  %v4863_v14 = vld [vmem:[#allocation32_spill] sm:$0xff]  ;;  %v3313_v55 = vld [vmem:[%s4800_s3 + $0x164] ss:$16 sps:$4 sm:$0xff]  }
 0x187   :  { %v1204_v39 = vmax.f32 %v1074_v29, %v1140_v24  ;;  %v1138_v52 = vmul.f32 0.2, %v1066_v9  ;;  %v1039_v29 = vadd.f32 %v4283_v20, %v4858_v11  ;;  %v1291_v31 = vpack.c.bf16 %v1186_v22, %v1185_v26  ;;  %v3298_v20 = vld [vmem:[%s4800_s3 + $0xc4] ss:$16 sps:$4 sm:$0xff]   ;;  %v3306_v58 = vld [vmem:[%s4800_s3 + $0x100] ss:$16 sps:$4 sm:$0xff]  }
 0x188   :  { %v1298_v24 = vpack.c.bf16 %v1200_v21, %v1199_v35  ;;  %v1117_v40 = vmul.f32 0.2, %v983_v41  ;;  %v1197_v50 = vmax.f32 %v1047_v4, %v1133_v27  ;;  %v1290_v6 = vpack.c.bf16 %v1184_v2, %v1183_v53  ;;  %v3301_v4 = vld [vmem:[%s4800_s3 + $0xe4] ss:$16 sps:$4 sm:$0xff]   ;;  %v3315_v48 = vld [vmem:[%s4800_s3 + $0x160] ss:$16 sps:$4 sm:$0xff]  }
 0x189   :  { %v1202_v33 = vmax.f32 %v1066_v9, %v1138_v52  ;;  %v1300_v42 = vpack.c.bf16 %v1204_v39, %v1203_v63  ;;  %v1131_v57 = vmul.f32 0.2, %v1039_v29  ;;  %v4860_v9 = vld [vmem:[#allocation27_spill] sm:$0xff]  ;;  %v1182_v54 = vmax.f32 %v986_v7, %v1118_v60  ;;  %v4862_v52 = vld [vmem:[#allocation29_spill] sm:$0xff]  ;;  %v3331_v8 = vld [vmem:[%s4800_s3 + $0x2c] ss:$16 sps:$4 sm:$0xff]  }
 0x18a   :  { %v1031_v36 = vadd.f32 %v4288_v13, %v4860_v9  ;;  %v1130_v5 = vmul.f32 0.2, %v1034_v44  ;;  %v1297_v63 = vpack.c.bf16 %v1198_v51, %v1197_v50  ;;  %v1181_v39 = vmax.f32 %v983_v41, %v1117_v40  ;;  %v3316_v41 = vld [vmem:[%s4800_s3 + $0x184] ss:$16 sps:$4 sm:$0xff]   ;;  %v3318_v26 = vld [vmem:[%s4800_s3 + $0x180] ss:$16 sps:$4 sm:$0xff]  }
 0x18b   :  { %1878 = vmatmul.mubr.bf16.gmra.mxu1 %v3294_v56  ;;  %2981 = vmatprep.subr.bf16.mxu1 %v1300_v42  ;;  %v1299_v19 = vpack.c.bf16 %v1202_v33, %v1201_v30  ;;  %v1023_v56 = vadd.f32 %v4268_v17, %v4862_v52  ;;  %v1195_v25 = vmax.f32 %v1039_v29, %v1131_v57  ;;  %v1128_v3 = vmul.f32 0.2, %v1026_v49  ;;  %v4864_v30 = vld [vmem:[#allocation31_spill] sm:$0xff]  ;;  %v3334_v51 = vld [vmem:[%s4800_s3 + $0x4c] ss:$16 sps:$4 sm:$0xff]  }
 0x18c   :  { %2982 = vmatpush3.bf16.msra.mxu1 %v1292_v59  ;;  %1885 = vmatprep.mubr.bf16.mxu1 %v3295_v1  ;;  %v1129_v16 = vmul.f32 0.2, %v1031_v36  ;;  %v1289_v13 = vpack.c.bf16 %v1182_v54, %v1181_v39  ;;  %v1018_v45 = vadd.f32 %v4281_v47, %v4863_v14  ;;  %v1194_v1 = vmax.f32 %v1034_v44, %v1130_v5  ;;  %v3319_v11 = vld [vmem:[%s4800_s3 + $0x1a4] ss:$16 sps:$4 sm:$0xff]   ;;  %v3321_v29 = vld [vmem:[%s4800_s3 + $0x1a0] ss:$16 sps:$4 sm:$0xff]  }
 0x18d   :  { %2983 = vmatprep.subr.bf16.mxu1 %v1299_v19  ;;  %v1296_v32 = vpack.c.bf16 %v1196_v28, %v1195_v25  ;;  %v1127_v17 = vmul.f32 0.2, %v1023_v56  ;;  %v1015_v33 = vadd.f32 %v4273_v15, %v4864_v30  ;;  %v1192_v62 = vmax.f32 %v1026_v49, %v1128_v3  ;;  %v3304_v15 = vld [vmem:[%s4800_s3 + $0x104] ss:$16 sps:$4 sm:$0xff]   ;;  %v3309_v19 = vld [vmem:[%s4800_s3 + $0x120] ss:$16 sps:$4 sm:$0xff]  }
 0x18e   :  { %v1193_v42 = vmax.f32 %v1031_v36, %v1129_v16  ;;  %v1126_v34 = vmul.f32 0.2, %v1018_v45  ;;  %v3322_v35 = vld [vmem:[%s4800_s3 + $0x1c4] ss:$16 sps:$4 sm:$0xff]   ;;  %v3324_v27 = vld [vmem:[%s4800_s3 + $0x1c0] ss:$16 sps:$4 sm:$0xff]  }
 0x18f   :  { %v1191_v7 = vmax.f32 %v1023_v56, %v1127_v17  ;;  %v1125_v59 = vmul.f32 0.2, %v1015_v33  ;;  %v3325_v2 = vld [vmem:[%s4800_s3 + $0x1e4] ss:$16 sps:$4 sm:$0xff]   ;;  %v3327_v60 = vld [vmem:[%s4800_s3 + $0x1e0] ss:$16 sps:$4 sm:$0xff]  }
 0x190   :  { %2984 = vmatpush3.bf16.msra.mxu1 %v1291_v31  ;;  %v1295_v47 = vpack.c.bf16 %v1194_v1, %v1193_v42  ;;  %v1190_v22 = vmax.f32 %v1018_v45, %v1126_v34  ;;  %v3330_v31 = vld [vmem:[%s4800_s3 + $0xc] ss:$16 sps:$4 sm:$0xff]   ;;  %v3333_v44 = vld [vmem:[%s4800_s3 + $0x28] ss:$16 sps:$4 sm:$0xff]  }
 0x191   :  { %2985 = vmatprep.subr.bf16.mxu1 %v1298_v24  ;;  %v1294_v10 = vpack.c.bf16 %v1192_v62, %v1191_v7  ;;  %v1189_v21 = vmax.f32 %v1015_v33, %v1125_v59  ;;  %v3336_v24 = vld [vmem:[%s4800_s3 + $0x48] ss:$16 sps:$4 sm:$0xff]   ;;  %v3340_v40 = vld [vmem:[%s4800_s3 + $0x8c] ss:$16 sps:$4 sm:$0xff]  }
 0x192   :  { %v3339_v53 = vld [vmem:[%s4800_s3 + $0x68] ss:$16 sps:$4 sm:$0xff]   ;;  %v3343_v57 = vld [vmem:[%s4800_s3 + $0xac] ss:$16 sps:$4 sm:$0xff]  }
 0x193   :  { %1886 = vmatmul.mubr.bf16.gmra.mxu1 %v3297_v18  ;;  %v3337_v18 = vld [vmem:[%s4800_s3 + $0x6c] ss:$16 sps:$4 sm:$0xff]   ;;  %v3345_v9 = vld [vmem:[%s4800_s3 + $0xa8] ss:$16 sps:$4 sm:$0xff]  }
 0x194   :  { %2986 = vmatpush3.bf16.msra.mxu1 %v1290_v6  ;;  %1893 = vmatprep.mubr.bf16.mxu1 %v3298_v20  ;;  %v3342_v20 = vld [vmem:[%s4800_s3 + $0x88] ss:$16 sps:$4 sm:$0xff]   ;;  %v3346_v36 = vld [vmem:[%s4800_s3 + $0xcc] ss:$16 sps:$4 sm:$0xff]  }
 0x195   :  { %2987 = vmatprep.subr.bf16.mxu1 %v1297_v63  ;;  %v3348_v50 = vld [vmem:[%s4800_s3 + $0xc8] ss:$16 sps:$4 sm:$0xff]   ;;  %v3349_v6 = vld [vmem:[%s4800_s3 + $0xec] ss:$16 sps:$4 sm:$0xff]  }
 0x196   :  { %v3351_v54 = vld [vmem:[%s4800_s3 + $0xe8] ss:$16 sps:$4 sm:$0xff]   ;;  %v3355_v28 = vld [vmem:[%s4800_s3 + $0x12c] ss:$16 sps:$4 sm:$0xff]  }
 0x197   :  { %v3354_v49 = vld [vmem:[%s4800_s3 + $0x108] ss:$16 sps:$4 sm:$0xff]   ;;  %v3358_v25 = vld [vmem:[%s4800_s3 + $0x14c] ss:$16 sps:$4 sm:$0xff]  }
 0x198   :  { %2988 = vmatpush3.bf16.msra.mxu1 %v1289_v13  ;;  %v3357_v56 = vld [vmem:[%s4800_s3 + $0x128] ss:$16 sps:$4 sm:$0xff]  }
 0x199   :  { %2989 = vmatprep.subr.bf16.mxu1 %v1296_v32  ;;  %v3360_v32 = vld [vmem:[%s4800_s3 + $0x148] ss:$16 sps:$4 sm:$0xff]  }
 0x19a   :  { %v3363_v34 = vld [vmem:[%s4800_s3 + $0x168] ss:$16 sps:$4 sm:$0xff]  }
 0x19b   :  { %1894 = vmatmul.mubr.bf16.gmra.mxu1 %v3300_v43  ;;  %v3361_v43 = vld [vmem:[%s4800_s3 + $0x16c] ss:$16 sps:$4 sm:$0xff]  }
 0x19c   :  { %2990 = vmatpush3.bf16.msra.mxu1 %v4257_v37  ;;  %1901 = vmatprep.mubr.bf16.mxu1 %v3301_v4  ;;  %v1293_v37 = vpack.c.bf16 %v1190_v22, %v1189_v21  ;;  %v3364_v21 = vld [vmem:[%s4800_s3 + $0x188] ss:$16 sps:$4 sm:$0xff]  }
 0x19d   :  { %2991 = vmatprep.subr.bf16.mxu1 %v1295_v47  ;;  %v3366_v47 = vld [vmem:[%s4800_s3 + $0x18c] ss:$16 sps:$4 sm:$0xff]  }
 0x1a0   :  { %2992 = vmatpush3.bf16.msra.mxu1 %v4261_v46  ;;  %v3307_v46 = vld [vmem:[%s4800_s3 + $0x124] ss:$16 sps:$4 sm:$0xff]  }
 0x1a1   :  { %2993 = vmatprep.subr.bf16.mxu1 %v1294_v10 }
 0x1a3   :  { %1902 = vmatmul.mubr.bf16.gmra.mxu1 %v3303_v61 }
 0x1a4   :  { %2994 = vmatpush3.bf16.msra.mxu1 %v4229_v0  ;;  %1909 = vmatprep.mubr.bf16.mxu1 %v3304_v15  ;;  %v3310_v0 = vld [vmem:[%s4800_s3 + $0x144] ss:$16 sps:$4 sm:$0xff]  }
 0x1a5   :  { %2995 = vmatprep.subr.bf16.mxu1 %v1293_v37  ;;  %v3369_v37 = vld [vmem:[%s4800_s3 + $0x1ac] ss:$16 sps:$4 sm:$0xff]  }
 0x1a8   :  { %2996 = vmatpush3.bf16.msra.mxu1 %v4241_v23  ;;  %v3312_v23 = vld [vmem:[%s4800_s3 + $0x140] ss:$16 sps:$4 sm:$0xff]  }
 0x1ab   :  { %1910 = vmatmul.mubr.bf16.gmra.mxu1 %v3306_v58 }
 0x1ac   :  { %1917 = vmatprep.mubr.bf16.mxu1 %v3307_v46 }
 0x1b3   :  { %1918 = vmatmul.mubr.bf16.gmra.mxu1 %v3309_v19 }
 0x1b4   :  { %1925 = vmatprep.mubr.bf16.mxu1 %v3310_v0 }
 0x1bb   :  { %1926 = vmatmul.mubr.bf16.gmra.mxu1 %v3312_v23 }
 0x1bc   :  { %1933 = vmatprep.mubr.bf16.mxu1 %v3313_v55 }
 0x1c3   :  { %1934 = vmatmul.mubr.bf16.gmra.mxu1 %v3315_v48  ;;  %v3367_v48 = vld [vmem:[%s4800_s3 + $0x1a8] ss:$16 sps:$4 sm:$0xff]  }
 0x1c4   :  { %1941 = vmatprep.mubr.bf16.mxu1 %v3316_v41  ;;  %v3372_v41 = vld [vmem:[%s4800_s3 + $0x1cc] ss:$16 sps:$4 sm:$0xff]  }
 0x1cb   :  { %1942 = vmatmul.mubr.bf16.gmra.mxu1 %v3318_v26 }
 0x1cc   :  { %1949 = vmatprep.mubr.bf16.mxu1 %v3319_v11 }
 0x1d3   :  { %1950 = vmatmul.mubr.bf16.gmra.mxu1 %v3321_v29  ;;  %v4522_v29 = vpop.permute.xlu0 %1485 }
 0x1d4   :  { %1957 = vmatprep.mubr.bf16.mxu1 %v3322_v35  ;;  %4865 = vst [vmem:[#allocation3_spill] sm:$0xff] %v4522_v29 }
 0x1db   :  { %1958 = vmatmul.mubr.bf16.gmra.mxu1 %v3324_v27 }
 0x1dc   :  { %1965 = vmatprep.mubr.bf16.mxu1 %v3325_v2 }
 0x1e3   :  { %1966 = vmatmul.mubr.bf16.gmra.mxu1 %v3327_v60  ;;  %v4526_v60 = vpop.permute.xlu1 %1490 }
 0x1e4   :  { %2006 = vmatprep.mubr.bf16.mxu1 %v3330_v31  ;;  %4866 = vst [vmem:[#allocation26_spill] sm:$0xff] %v4526_v60 }
 0x1eb   :  { %2007 = vmatmul.mubr.bf16.vlgmr.msra.gmra.mxu1 %v3328_v12  ;;  %v3370_v12 = vld [vmem:[%s4800_s3 + $0x1c8] ss:$16 sps:$4 sm:$0xff]  }
 0x1ec   :  { %2014 = vmatprep.mubr.bf16.mxu1 %v3331_v8  ;;  %v3375_v8 = vld [vmem:[%s4800_s3 + $0x1ec] ss:$16 sps:$4 sm:$0xff]  }
 0x1f3   :  { %2015 = vmatmul.mubr.bf16.gmra.mxu1 %v3333_v44  ;;  %v4534_v44 = vpop.permute.xlu0 %1405 }
 0x1f4   :  { %2022 = vmatprep.mubr.bf16.mxu1 %v3334_v51 }
 0x1fb   :  { %2023 = vmatmul.mubr.bf16.gmra.mxu1 %v3336_v24 }
 0x1fc   :  { %2030 = vmatprep.mubr.bf16.mxu1 %v3337_v18 }
 0x203   :  { %2031 = vmatmul.mubr.bf16.gmra.mxu1 %v3339_v53  ;;  %v4538_v53 = vpop.permute.xlu1 %1410 }
 0x204   :  { %2038 = vmatprep.mubr.bf16.mxu1 %v3340_v40 }
 0x20b   :  { %2039 = vmatmul.mubr.bf16.gmra.mxu1 %v3342_v20 }
 0x20c   :  { %2046 = vmatprep.mubr.bf16.mxu1 %v3343_v57  ;;  %v4542_v57 = vpop.permute.xlu0 %1475 }
 0x20d   :  { %4867 = vst [vmem:[#allocation21_spill] sm:$0xff] %v4542_v57 }
 0x213   :  { %2047 = vmatmul.mubr.bf16.gmra.mxu1 %v3345_v9 }
 0x214   :  { %2054 = vmatprep.mubr.bf16.mxu1 %v3346_v36  ;;  %v3373_v36 = vld [vmem:[%s4800_s3 + $0x1e8] ss:$16 sps:$4 sm:$0xff]  }
 0x21b   :  { %2055 = vmatmul.mubr.bf16.gmra.mxu1 %v3348_v50 }
 0x21c   :  { %2062 = vmatprep.mubr.bf16.mxu1 %v3349_v6 }
 0x223   :  { %2063 = vmatmul.mubr.bf16.gmra.mxu1 %v3351_v54  ;;  %v4549_v54 = vpop.permute.xlu1 %1480 }
 0x224   :  { %2070 = vmatprep.mubr.bf16.mxu1 %v3352_v38  ;;  %4868 = vst [vmem:[#allocation22_spill] sm:$0xff] %v4549_v54 }
 0x22b   :  { %v2885_v5 = vpop.f32.mrf.mxu1  ;;  %2071 = vmatmul.mubr.bf16.gmra.mxu1 %v3354_v49  ;;  %v4551_v49 = vpop.permute.xlu0 %1395 }
 0x22c   :  { %2078 = vmatprep.mubr.bf16.mxu1 %v3355_v28 }
 0x22d   :  { %v2886_v63 = vpop.f32.mrf.mxu1 }
 0x22e   :  { %v4472_v39 = vadd.f32 %v2886_v63, %v2885_v5 }
 0x22f   :  { %v2888_v52 = vpop.f32.mrf.mxu1 }
 0x231   :  { %v2889_v16 = vpop.f32.mrf.mxu1 }
 0x232   :  { %v4480_v13 = vadd.f32 %v2889_v16, %v2888_v52  ;;  %v4555_v52 = vpop.permute.xlu1 %1400  ;;  %v4559_v16 = vpop.permute.xlu0 %1465 }
 0x233   :  { %v2891_v3 = vpop.f32.mrf.mxu1  ;;  %2079 = vmatmul.mubr.bf16.gmra.mxu1 %v3357_v56  ;;  %4869 = vst [vmem:[#allocation16_spill] sm:$0xff] %v4559_v16 }
 0x234   :  { %2086 = vmatprep.mubr.bf16.mxu1 %v3358_v25 }
 0x235   :  { %v2892_v14 = vpop.f32.mrf.mxu1 }
 0x236   :  { %v4482_v45 = vadd.f32 %v2892_v14, %v2891_v3 }
 0x237   :  { %v2894_v1 = vpop.f32.mrf.mxu1 }
 0x239   :  { %v2895_v4 = vpop.f32.mrf.mxu1 }
 0x23a   :  { %v4490_v17 = vadd.f32 %v2895_v4, %v2894_v1  ;;  %v4565_v4 = vpop.permute.xlu0 %1385 }
 0x23b   :  { %v2897_v30 = vpop.f32.mrf.mxu1  ;;  %2087 = vmatmul.mubr.bf16.gmra.mxu1 %v3360_v32  ;;  %v4563_v32 = vpop.permute.xlu1 %1470 }
 0x23c   :  { %2094 = vmatprep.mubr.bf16.mxu1 %v3361_v43  ;;  %4870 = vst [vmem:[#allocation18_spill] sm:$0xff] %v4563_v32 }
 0x23d   :  { %v2898_v33 = vpop.f32.mrf.mxu1 }
 0x23e   :  { %v4492_v42 = vadd.f32 %v2898_v33, %v2897_v30 }
 0x23f   :  { %v2900_v62 = vpop.f32.mrf.mxu1 }
 0x241   :  { %v2901_v7 = vpop.f32.mrf.mxu1 }
 0x242   :  { %v4500_v59 = vadd.f32 %v2901_v7, %v2900_v62 }
 0x243   :  { %v2903_v22 = vpop.f32.mrf.mxu1  ;;  %2095 = vmatmul.mubr.bf16.gmra.mxu1 %v3363_v34  ;;  %v4569_v34 = vpop.permute.xlu1 %1390 }
 0x244   :  { %2102 = vmatprep.mubr.bf16.mxu1 %v3366_v47 }
 0x245   :  { %v2904_v10 = vpop.f32.mrf.mxu1 }
 0x246   :  { %v4502_v61 = vadd.f32 %v2904_v10, %v2903_v22  ;;  %v4573_v22 = vpop.permute.xlu0 %1455 }
 0x247   :  { %v2906_v15 = vpop.f32.mrf.mxu1  ;;  %4871 = vst [vmem:[#allocation7_spill] sm:$0xff] %v4573_v22 }
 0x249   :  { %v2907_v58 = vpop.f32.mrf.mxu1 }
 0x24a   :  { %v4510_v46 = vadd.f32 %v2907_v58, %v2906_v15 }
 0x24b   :  { %v2909_v19 = vpop.f32.mrf.mxu1  ;;  %2103 = vmatmul.mubr.bf16.gmra.mxu1 %v3364_v21 }
 0x24c   :  { %2110 = vmatprep.mubr.bf16.mxu1 %v3369_v37  ;;  %v4577_v37 = vpop.permute.xlu1 %1460 }
 0x24d   :  { %v2910_v0 = vpop.f32.mrf.mxu1  ;;  %4872 = vst [vmem:[#allocation4_spill] sm:$0xff] %v4577_v37 }
 0x24e   :  { %v4512_v23 = vadd.f32 %v2910_v0, %v2909_v19  ;;  %v4579_v19 = vpop.permute.xlu0 %1375 }
 0x24f   :  { %v2912_v55 = vpop.f32.mrf.mxu1 }
 0x251   :  { %v2913_v26 = vpop.f32.mrf.mxu1 }
 0x252   :  { %v4520_v11 = vadd.f32 %v2913_v26, %v2912_v55 }
 0x253   :  { %v2915_v35 = vpop.f32.mrf.mxu1  ;;  %2111 = vmatmul.mubr.bf16.gmra.mxu1 %v3367_v48 }
 0x254   :  { %2118 = vmatprep.mubr.bf16.mxu1 %v3372_v41  ;;  %v4583_v41 = vpop.permute.xlu1 %1380 }
 0x255   :  { %v2916_v27 = vpop.f32.mrf.mxu1 }
 0x256   :  { %v4524_v2 = vadd.f32 %v2916_v27, %v2915_v35  ;;  %v4587_v27 = vpop.permute.xlu0 %1445 }
 0x257   :  { %v2918_v31 = vpop.f32.mrf.mxu1 }
 0x259   :  { %v2919_v51 = vpop.f32.mrf.mxu1 }
 0x25a   :  { %v4536_v24 = vadd.f32 %v2919_v51, %v2918_v31  ;;  %v4591_v51 = vpop.permute.xlu1 %1450 }
 0x25b   :  { %v2921_v18 = vpop.f32.mrf.mxu1  ;;  %2119 = vmatmul.mubr.bf16.gmra.mxu1 %v3370_v12  ;;  %4874 = vst [vmem:[#allocation8_spill] sm:$0xff] %v4591_v51 }
 0x25c   :  { %2126 = vmatprep.mubr.bf16.mxu1 %v3375_v8 }
 0x25d   :  { %v2922_v40 = vpop.f32.mrf.mxu1 }
 0x25e   :  { %v4540_v20 = vadd.f32 %v2922_v40, %v2921_v18  ;;  %v4593_v40 = vpop.permute.xlu0 %1365 }
 0x25f   :  { %v2924_v9 = vpop.f32.mrf.mxu1 }
 0x261   :  { %v2925_v50 = vpop.f32.mrf.mxu1 }
 0x262   :  { %v4547_v6 = vadd.f32 %v2925_v50, %v2924_v9 }
 0x263   :  { %v2927_v38 = vpop.f32.mrf.mxu1  ;;  %2127 = vmatmul.mubr.bf16.gmra.mxu1 %v3373_v36 }
 0x265   :  { %v2928_v28 = vpop.f32.mrf.mxu1 }
 0x266   :  { %v4553_v5 = vadd.f32 %v2928_v28, %v2927_v38  ;;  %v4597_v38 = vpop.permute.xlu1 %1370 }
 0x267   :  { %v2930_v63 = vpop.f32.mrf.mxu1 }
 0x269   :  { %v2931_v56 = vpop.f32.mrf.mxu1 }
 0x26a   :  { %v4557_v25 = vadd.f32 %v2931_v56, %v2930_v63  ;;  %v4601_v56 = vpop.permute.xlu0 %1435 }
 0x26b   :  { %v2933_v3 = vpop.f32.mrf.mxu1 }
 0x26d   :  { %v2934_v14 = vpop.f32.mrf.mxu1 }
 0x26e   :  { %v4561_v1 = vadd.f32 %v2934_v14, %v2933_v3 }
 0x26f   :  { %v2936_v43 = vpop.f32.mrf.mxu1 }
 0x271   :  { %v2937_v30 = vpop.f32.mrf.mxu1 }
 0x272   :  { %v4567_v33 = vadd.f32 %v2937_v30, %v2936_v43  ;;  %v4605_v30 = vpop.permute.xlu1 %1440 }
 0x273   :  { %v2939_v62 = vpop.f32.mrf.mxu1 }
 0x275   :  { %v2940_v47 = vpop.f32.mrf.mxu1 }
 0x276   :  { %v4571_v7 = vadd.f32 %v2940_v47, %v2939_v62  ;;  %v1356_v47 = vpop.permute.xlu0 %1355 }
 0x277   :  { %v2942_v10 = vpop.f32.mrf.mxu1 }
 0x279   :  { %v2943_v15 = vpop.f32.mrf.mxu1 }
 0x27a   :  { %v4575_v21 = vadd.f32 %v2943_v15, %v2942_v10 }
 0x27b   :  { %v2945_v58 = vpop.f32.mrf.mxu1 }
 0x27d   :  { %v2946_v0 = vpop.f32.mrf.mxu1 }
 0x27e   :  { %v4581_v55 = vadd.f32 %v2946_v0, %v2945_v58  ;;  %v1361_v0 = vpop.permute.xlu1 %1360 }
 0x27f   :  { %v2948_v48 = vpop.f32.mrf.mxu1 }
 0x281   :  { %v2949_v26 = vpop.f32.mrf.mxu1 }
 0x282   :  { %v4585_v35 = vadd.f32 %v2949_v26, %v2948_v48 }
 0x283   :  { %v2951_v31 = vpop.f32.mrf.mxu1 }
 0x285   :  { %v2952_v12 = vpop.f32.mrf.mxu1 }
 0x286   :  { %v4589_v8 = vadd.f32 %v2952_v12, %v2951_v31  ;;  %v4611_v31 = vpop.permute.xlu0 %1425 }
 0x287   :  { %v2954_v18 = vpop.f32.mrf.mxu1 }
 0x288   :  { %4873 = vst [vmem:[#allocation6_spill] sm:$0xff] %v4589_v8 }
 0x289   :  { %v2955_v9 = vpop.f32.mrf.mxu1 }
 0x28a   :  { %v4595_v36 = vadd.f32 %v2955_v9, %v2954_v18 }
 0x28b   :  { %v2957_v50 = vpop.f32.mrf.mxu1 }
 0x28c   :  { %4875 = vst [vmem:[#allocation11_spill] sm:$0xff] %v4595_v36 }
 0x28d   :  { %v2958_v28 = vpop.f32.mrf.mxu1 }
 0x28e   :  { %v4599_v63 = vadd.f32 %v2958_v28, %v2957_v50  ;;  %v4615_v50 = vpop.permute.xlu1 %1430 }
 0x28f   :  { %v2960_v3 = vpop.f32.mrf.mxu1 }
 0x290   :  { %4876 = vst [vmem:[#allocation13_spill] sm:$0xff] %v4599_v63 }
 0x291   :  { %v2961_v14 = vpop.f32.mrf.mxu1 }
 0x292   :  { %v4603_v43 = vadd.f32 %v2961_v14, %v2960_v3  ;;  %v1346_v3 = vpop.permute.xlu0 %1345 }
 0x293   :  { %v2963_v62 = vpop.f32.mrf.mxu1 }
 0x294   :  { %4877 = vst [vmem:[#allocation5_spill] sm:$0xff] %v4603_v43 }
 0x295   :  { %v2964_v10 = vpop.f32.mrf.mxu1 }
 0x296   :  { %v4607_v15 = vadd.f32 %v2964_v10, %v2963_v62  ;;  %v1351_v10 = vpop.permute.xlu1 %1350 }
 0x297   :  { %v2966_v58 = vpop.f32.mrf.mxu1 }
 0x298   :  { %4878 = vst [vmem:[#allocation10_spill] sm:$0xff] %v4607_v15 }
 0x299   :  { %v2967_v48 = vpop.f32.mrf.mxu1 }
 0x29a   :  { %v4609_v26 = vadd.f32 %v2967_v48, %v2966_v58  ;;  %v4621_v58 = vpop.permute.xlu0 %1415 }
 0x29b   :  { %v2969_v12 = vpop.f32.mrf.mxu1 }
 0x29c   :  { %4879 = vst [vmem:[#allocation12_spill] sm:$0xff] %v4609_v26 }
 0x29d   :  { %v2970_v18 = vpop.f32.mrf.mxu1 }
 0x29e   :  { %v4613_v9 = vadd.f32 %v2970_v18, %v2969_v12  ;;  %v4625_v12 = vpop.permute.xlu1 %1420 }
 0x29f   :  { %v2972_v28 = vpop.f32.mrf.mxu1 }
 0x2a0   :  { %4880 = vst [vmem:[#allocation9_spill] sm:$0xff] %v4613_v9  ;;  %v1336_v9 = vpop.permute.xlu0 %1335 }
 0x2a1   :  { %v2973_v14 = vpop.f32.mrf.mxu1  ;;  %v1848_v15 = vadd.f32 %v4472_v39, %v1336_v9 }
 0x2a2   :  { %v4617_v60 = vadd.f32 %v2973_v14, %v2972_v28  ;;  %v1341_v16 = vpop.permute.xlu1 %1340 }
 0x2a3   :  { %v2975_v62 = vpop.f32.mrf.mxu1 }
 0x2a4   :  { %4881 = vst [vmem:[#allocation15_spill] sm:$0xff] %v4617_v60 }
 0x2a5   :  { %v2976_v29 = vpop.f32.mrf.mxu1 }
 0x2a6   :  { %v4619_v54 = vadd.f32 %v2976_v29, %v2975_v62  ;;  %v1851_v29 = vadd.f32 %v4480_v13, %v1341_v16 }
 0x2a7   :  { %v2978_v48 = vpop.f32.mrf.mxu1 }
 0x2a8   :  { %4882 = vst [vmem:[#allocation19_spill] sm:$0xff] %v4619_v54 }
 0x2a9   :  { %v2979_v57 = vpop.f32.mrf.mxu1 }
 0x2aa   :  { %v4623_v26 = vadd.f32 %v2979_v57, %v2978_v48  ;;  %v1856_v48 = vadd.f32 %v4482_v45, %v1346_v3 }
 0x2ab   :  { %v2997_v18 = vpop.f32.mrf.mxu1 }
 0x2ac   :  { %4883 = vst [vmem:[#allocation14_spill] sm:$0xff] %v4623_v26 }
 0x2ad   :  { %v2998_v32 = vpop.f32.mrf.mxu1 }
 0x2ae   :  { %v2999_v28 = vadd.f32 %v2998_v32, %v2997_v18 }
 0x2af   :  { %v3000_v14 = vpop.f32.mrf.mxu1 }
 0x2b0   :  { %v2009_v60 = vadd.f32 %v2999_v28, %v1848_v15  ;;  %v1859_v15 = vadd.f32 %v4490_v17, %v1351_v10  ;;  %v1872_v10 = vadd.f32 %v4502_v61, %v4593_v40  ;;  %v1880_v61 = vadd.f32 %v4512_v23, %v4579_v19 }
 0x2b1   :  { %v3001_v43 = vpop.f32.mrf.mxu1 }
 0x2b2   :  { %v3002_v62 = vadd.f32 %v3001_v43, %v3000_v14  ;;  %v2135_v37 = vmul.f32 0.2, %v2009_v60  ;;  %v1864_v14 = vadd.f32 %v4492_v42, %v1356_v47 }
 0x2b3   :  { %v3003_v54 = vpop.f32.mrf.mxu1 }
 0x2b4   :  { %v2012_v63 = vadd.f32 %v3002_v62, %v1851_v29  ;;  %v2167_v51 = vmax.f32 %v2009_v60, %v2135_v37 }
 0x2b5   :  { %v3004_v57 = vpop.f32.mrf.mxu1 }
 0x2b6   :  { %v2136_v26 = vmul.f32 0.2, %v2012_v63  ;;  %v3005_v22 = vadd.f32 %v3004_v57, %v3003_v54 }
 0x2b7   :  { %v3006_v36 = vpop.f32.mrf.mxu1 }
 0x2b8   :  { %v2168_v8 = vmax.f32 %v2012_v63, %v2136_v26  ;;  %v2017_v39 = vadd.f32 %v3005_v22, %v1856_v48  ;;  %v1867_v22 = vadd.f32 %v4500_v59, %v1361_v0  ;;  %v1875_v59 = vadd.f32 %v4510_v46, %v4597_v38 }
 0x2b9   :  { %v3007_v32 = vpop.f32.mrf.mxu1  ;;  %v1883_v46 = vadd.f32 %v4520_v11, %v4583_v41 }
 0x2ba   :  { %v4631_v9 = vpack.c.bf16 %v2168_v8, %v2167_v51  ;;  %v3008_v18 = vadd.f32 %v3007_v32, %v3006_v36  ;;  %v2137_v16 = vmul.f32 0.2, %v2017_v39 }
 0x2bb   :  { %v3009_v13 = vpop.f32.mrf.mxu1 }
 0x2bc   :  { %v2020_v43 = vadd.f32 %v3008_v18, %v1859_v15  ;;  %v2169_v54 = vmax.f32 %v2017_v39, %v2137_v16 }
 0x2bd   :  { %v3010_v28 = vpop.f32.mrf.mxu1 }
 0x2be   :  { %v2138_v29 = vmul.f32 0.2, %v2020_v43  ;;  %v3011_v45 = vadd.f32 %v3010_v28, %v3009_v13 }
 0x2bf   :  { %v3012_v3 = vpop.f32.mrf.mxu1 }
 0x2c0   :  { %v2170_v62 = vmax.f32 %v2020_v43, %v2138_v29  ;;  %v2025_v60 = vadd.f32 %v3011_v45, %v1864_v14 }
 0x2c1   :  { %v3013_v37 = vpop.f32.mrf.mxu1 }
 0x2c2   :  { %v4635_v63 = vpack.c.bf16 %v2170_v62, %v2169_v54  ;;  %v3014_v17 = vadd.f32 %v3013_v37, %v3012_v3  ;;  %v2139_v51 = vmul.f32 0.2, %v2025_v60  ;;  %v3378_v37 = vld [vmem:[%s4801_s5 + $0x4] ss:$8 sps:$4 sm:$0xff]  }
 0x2c3   :  { %v3015_v8 = vpop.f32.mrf.mxu1  ;;  %2439 = vmatprep.mubr.bf16.mxu0 %v3378_v37 }
 0x2c4   :  { %v2028_v36 = vadd.f32 %v3014_v17, %v1867_v22  ;;  %v2171_v48 = vmax.f32 %v2025_v60, %v2139_v51 }
 0x2c5   :  { %v3016_v26 = vpop.f32.mrf.mxu1 }
 0x2c6   :  { %v2140_v42 = vmul.f32 0.2, %v2028_v36  ;;  %v3017_v47 = vadd.f32 %v3016_v26, %v3015_v8  ;;  %v1888_v8 = vadd.f32 %v4524_v2, %v4565_v4  ;;  %v1896_v2 = vadd.f32 %v4540_v20, %v4551_v49 }
 0x2c7   :  { %v3018_v57 = vpop.f32.mrf.mxu1  ;;  %v1904_v20 = vadd.f32 %v4553_v5, %v4534_v44  ;;  %v1912_v44 = vadd.f32 %v4561_v1, %v4621_v58  ;;  %v1920_v1 = vadd.f32 %v4571_v7, %v4611_v31  ;;  %v1928_v7 = vadd.f32 %v4581_v55, %v4601_v56 }
 0x2c8   :  { %v2172_v39 = vmax.f32 %v2028_v36, %v2140_v42  ;;  %v2033_v32 = vadd.f32 %v3017_v47, %v1872_v10  ;;  %v1891_v47 = vadd.f32 %v4536_v24, %v4569_v34  ;;  %v1899_v24 = vadd.f32 %v4547_v6, %v4555_v52 }
 0x2c9   :  { %v3019_v15 = vpop.f32.mrf.mxu1  ;;  %v1907_v6 = vadd.f32 %v4557_v25, %v4538_v53  ;;  %v1915_v53 = vadd.f32 %v4567_v33, %v4625_v12  ;;  %v1923_v33 = vadd.f32 %v4575_v21, %v4615_v50  ;;  %v1931_v21 = vadd.f32 %v4585_v35, %v4605_v30 }
 0x2ca   :  { %v4641_v0 = vpack.c.bf16 %v2172_v39, %v2171_v48  ;;  %v3020_v18 = vadd.f32 %v3019_v15, %v3018_v57  ;;  %v2141_v16 = vmul.f32 0.2, %v2033_v32 }
 0x2cb   :  { %v3021_v13 = vpop.f32.mrf.mxu1 }
 0x2cc   :  { %v2036_v43 = vadd.f32 %v3020_v18, %v1875_v59  ;;  %v2173_v45 = vmax.f32 %v2033_v32, %v2141_v16 }
 0x2cd   :  { %v3022_v28 = vpop.f32.mrf.mxu1 }
 0x2ce   :  { %v2142_v40 = vmul.f32 0.2, %v2036_v43  ;;  %v3023_v14 = vadd.f32 %v3022_v28, %v3021_v13 }
 0x2cf   :  { %v3024_v29 = vpop.f32.mrf.mxu1 }
 0x2d0   :  { %v2174_v3 = vmax.f32 %v2036_v43, %v2142_v40  ;;  %v2041_v54 = vadd.f32 %v3023_v14, %v1880_v61 }
 0x2d1   :  { %v3025_v62 = vpop.f32.mrf.mxu1 }
 0x2d2   :  { %v4647_v38 = vpack.c.bf16 %v2174_v3, %v2173_v45  ;;  %v3026_v60 = vadd.f32 %v3025_v62, %v3024_v29  ;;  %v2143_v17 = vmul.f32 0.2, %v2041_v54 }
 0x2d3   :  { %v3027_v22 = vpop.f32.mrf.mxu1 }
 0x2d4   :  { %v2044_v23 = vadd.f32 %v3026_v60, %v1883_v46  ;;  %v2175_v10 = vmax.f32 %v2041_v54, %v2143_v17 }
 0x2d5   :  { %v3028_v19 = vpop.f32.mrf.mxu1 }
 0x2d6   :  { %v2144_v51 = vmul.f32 0.2, %v2044_v23  ;;  %v3029_v36 = vadd.f32 %v3028_v19, %v3027_v22 }
 0x2d7   :  { %v3030_v26 = vpop.f32.mrf.mxu1 }
 0x2d8   :  { %v2176_v11 = vmax.f32 %v2044_v23, %v2144_v51  ;;  %v2049_v41 = vadd.f32 %v3029_v36, %v1888_v8 }
 0x2d9   :  { %v3031_v42 = vpop.f32.mrf.mxu1 }
 0x2da   :  { %v4656_v57 = vpack.c.bf16 %v2176_v11, %v2175_v10  ;;  %v3032_v48 = vadd.f32 %v3031_v42, %v3030_v26  ;;  %v2145_v32 = vmul.f32 0.2, %v2049_v41 }
 0x2db   :  { %v3033_v39 = vpop.f32.mrf.mxu1 }
 0x2dc   :  { %v2052_v15 = vadd.f32 %v3032_v48, %v1891_v47  ;;  %v2177_v16 = vmax.f32 %v2049_v41, %v2145_v32 }
 0x2dd   :  { %v3034_v59 = vpop.f32.mrf.mxu1 }
 0x2de   :  { %v2146_v4 = vmul.f32 0.2, %v2052_v15  ;;  %v3035_v18 = vadd.f32 %v3034_v59, %v3033_v39 }
 0x2df   :  { %v3036_v13 = vpop.f32.mrf.mxu1 }
 0x2e0   :  { %v2178_v43 = vmax.f32 %v2052_v15, %v2146_v4  ;;  %v2057_v28 = vadd.f32 %v3035_v18, %v1896_v2 }
 0x2e1   :  { %v3037_v61 = vpop.f32.mrf.mxu1 }
 0x2e2   :  { %v4662_v34 = vpack.c.bf16 %v2178_v43, %v2177_v16  ;;  %v3038_v40 = vadd.f32 %v3037_v61, %v3036_v13  ;;  %v2147_v29 = vmul.f32 0.2, %v2057_v28 }
 0x2e3   :  { %v3039_v14 = vpop.f32.mrf.mxu1 }
 0x2e4   :  { %v2060_v45 = vadd.f32 %v3038_v40, %v1899_v24  ;;  %v2179_v46 = vmax.f32 %v2057_v28, %v2147_v29 }
 0x2e5   :  { %v3040_v3 = vpop.f32.mrf.mxu1 }
 0x2e6   :  { %v2148_v49 = vmul.f32 0.2, %v2060_v45  ;;  %v3041_v54 = vadd.f32 %v3040_v3, %v3039_v14 }
 0x2e7   :  { %v3042_v62 = vpop.f32.mrf.mxu1 }
 0x2e8   :  { %v2180_v60 = vmax.f32 %v2060_v45, %v2148_v49  ;;  %v2065_v37 = vadd.f32 %v3041_v54, %v1904_v20 }
 0x2e9   :  { %v3043_v22 = vpop.f32.mrf.mxu1 }
 0x2ea   :  { %v4668_v52 = vpack.c.bf16 %v2180_v60, %v2179_v46  ;;  %v3044_v17 = vadd.f32 %v3043_v22, %v3042_v62  ;;  %v2149_v19 = vmul.f32 0.2, %v2065_v37  ;;  %v4884_v22 = vld [vmem:[#allocation6_spill] sm:$0xff] }
 0x2eb   :  { %v3045_v23 = vpop.f32.mrf.mxu1  ;;  %v1936_v55 = vadd.f32 %v4884_v22, %v4587_v27 }
 0x2ec   :  { %v2068_v8 = vadd.f32 %v3044_v17, %v1907_v6  ;;  %v2181_v10 = vmax.f32 %v2065_v37, %v2149_v19 }
 0x2ed   :  { %v3046_v51 = vpop.f32.mrf.mxu1 }
 0x2ee   :  { %v2150_v5 = vmul.f32 0.2, %v2068_v8  ;;  %v3047_v36 = vadd.f32 %v3046_v51, %v3045_v23 }
 0x2ef   :  { %v3048_v26 = vpop.f32.mrf.mxu1 }
 0x2f0   :  { %v2182_v11 = vmax.f32 %v2068_v8, %v2150_v5  ;;  %v2073_v41 = vadd.f32 %v3047_v36, %v1912_v44  ;;  %v4885_v44 = vld [vmem:[#allocation8_spill] sm:$0xff]  ;;  %v4886_v5 = vld [vmem:[#allocation11_spill] sm:$0xff] }
 0x2f1   :  { %v3049_v42 = vpop.f32.mrf.mxu1  ;;  %v1939_v35 = vadd.f32 %v4886_v5, %v4885_v44 }
 0x2f2   :  { %v4674_v25 = vpack.c.bf16 %v2182_v11, %v2181_v10  ;;  %v3050_v47 = vadd.f32 %v3049_v42, %v3048_v26  ;;  %v2151_v39 = vmul.f32 0.2, %v2073_v41  ;;  %v4887_v42 = vld [vmem:[#allocation7_spill] sm:$0xff] }
 0x2f3   :  { %v3051_v48 = vpop.f32.mrf.mxu1 }
 0x2f4   :  { %v2076_v32 = vadd.f32 %v3050_v47, %v1915_v53  ;;  %v2183_v4 = vmax.f32 %v2073_v41, %v2151_v39  ;;  %v4888_v53 = vld [vmem:[#allocation13_spill] sm:$0xff] }
 0x2f5   :  { %v3052_v15 = vpop.f32.mrf.mxu1  ;;  %v1944_v27 = vadd.f32 %v4888_v53, %v4887_v42 }
 0x2f6   :  { %v2152_v58 = vmul.f32 0.2, %v2076_v32  ;;  %v3053_v59 = vadd.f32 %v3052_v15, %v3051_v48 }
 0x2f7   :  { %v3054_v2 = vpop.f32.mrf.mxu1 }
 0x2f8   :  { %v2184_v18 = vmax.f32 %v2076_v32, %v2152_v58  ;;  %v2081_v13 = vadd.f32 %v3053_v59, %v1920_v1  ;;  %v4889_v59 = vld [vmem:[#allocation4_spill] sm:$0xff] }
 0x2f9   :  { %v3055_v16 = vpop.f32.mrf.mxu1 }
 0x2fa   :  { %v3056_v12 = vadd.f32 %v3055_v16, %v3054_v2  ;;  %v4680_v43 = vpack.c.bf16 %v2184_v18, %v2183_v4  ;;  %v2153_v61 = vmul.f32 0.2, %v2081_v13  ;;  %v4890_v2 = vld [vmem:[#allocation5_spill] sm:$0xff] }
 0x2fb   :  { %v3057_v28 = vpop.f32.mrf.mxu1  ;;  %v1947_v4 = vadd.f32 %v4890_v2, %v4889_v59 }
 0x2fc   :  { %v2084_v24 = vadd.f32 %v3056_v12, %v1923_v33  ;;  %v2185_v45 = vmax.f32 %v2081_v13, %v2153_v61  ;;  %v4891_v61 = vld [vmem:[#allocation16_spill] sm:$0xff] }
 0x2fd   :  { %v3058_v40 = vpop.f32.mrf.mxu1 }
 0x2fe   :  { %v2154_v31 = vmul.f32 0.2, %v2084_v24  ;;  %v3059_v14 = vadd.f32 %v3058_v40, %v3057_v28 }
 0x2ff   :  { %v3060_v29 = vpop.f32.mrf.mxu1 }
 0x300   :  { %v2186_v3 = vmax.f32 %v2084_v24, %v2154_v31  ;;  %v2089_v20 = vadd.f32 %v3059_v14, %v1928_v7  ;;  %v4892_v24 = vld [vmem:[#allocation10_spill] sm:$0xff] }
 0x301   :  { %v3061_v49 = vpop.f32.mrf.mxu1  ;;  %v1952_v40 = vadd.f32 %v4892_v24, %v4891_v61 }
 0x302   :  { %v3062_v50 = vadd.f32 %v3061_v49, %v3060_v29  ;;  %v4686_v54 = vpack.c.bf16 %v2186_v3, %v2185_v45  ;;  %v2155_v46 = vmul.f32 0.2, %v2089_v20  ;;  %v4893_v49 = vld [vmem:[#allocation18_spill] sm:$0xff] }
 0x303   :  { %v3063_v62 = vpop.f32.mrf.mxu1 }
 0x304   :  { %v2092_v60 = vadd.f32 %v3062_v50, %v1931_v21  ;;  %v2187_v23 = vmax.f32 %v2089_v20, %v2155_v46  ;;  %v4894_v21 = vld [vmem:[#allocation12_spill] sm:$0xff] }
 0x305   :  { %v3064_v37 = vpop.f32.mrf.mxu1  ;;  %v1955_v50 = vadd.f32 %v4894_v21, %v4893_v49  ;;  %v2250_v49 = vpop.permute.xlu0 %2249 }
 0x306   :  { %v2156_v56 = vmul.f32 0.2, %v2092_v60  ;;  %v3065_v6 = vadd.f32 %v3064_v37, %v3063_v62  ;;  %v2255_v21 = vpop.permute.xlu1 %2254 }
 0x307   :  { %v3066_v17 = vpop.f32.mrf.mxu1 }
 0x308   :  { %v2188_v19 = vmax.f32 %v2092_v60, %v2156_v56  ;;  %v2097_v8 = vadd.f32 %v3065_v6, %v1936_v55  ;;  %v4895_v56 = vld [vmem:[#allocation21_spill] sm:$0xff] }
 0x309   :  { %v3067_v51 = vpop.f32.mrf.mxu1  ;;  %v4896_v6 = vld [vmem:[#allocation9_spill] sm:$0xff] }
 0x30a   :  { %v3068_v30 = vadd.f32 %v3067_v51, %v3066_v17  ;;  %v4692_v36 = vpack.c.bf16 %v2188_v19, %v2187_v23  ;;  %v2157_v10 = vmul.f32 0.2, %v2097_v8  ;;  %v1960_v17 = vadd.f32 %v4896_v6, %v4895_v56 }
 0x30b   :  { %v3069_v26 = vpop.f32.mrf.mxu1 }
 0x30c   :  { %v2100_v11 = vadd.f32 %v3068_v30, %v1939_v35  ;;  %v2189_v32 = vmax.f32 %v2097_v8, %v2157_v10  ;;  %v4897_v30 = vld [vmem:[#allocation22_spill] sm:$0xff] }
 0x30d   :  { %v3070_v41 = vpop.f32.mrf.mxu1 }
 0x30e   :  { %v2158_v47 = vmul.f32 0.2, %v2100_v11  ;;  %v3071_v48 = vadd.f32 %v3070_v41, %v3069_v26  ;;  %v4898_v26 = vld [vmem:[#allocation15_spill] sm:$0xff] }
 0x30f   :  { %v3072_v39 = vpop.f32.mrf.mxu1  ;;  %v1963_v10 = vadd.f32 %v4898_v26, %v4897_v30 }
 0x310   :  { %v2190_v15 = vmax.f32 %v2100_v11, %v2158_v47  ;;  %v2105_v1 = vadd.f32 %v3071_v48, %v1944_v27  ;;  %v4899_v48 = vld [vmem:[#allocation3_spill] sm:$0xff] }
 0x311   :  { %v3073_v58 = vpop.f32.mrf.mxu1 }
 0x312   :  { %v3074_v18 = vadd.f32 %v3073_v58, %v3072_v39  ;;  %v2226_v13 = vpack.c.bf16 %v2190_v15, %v2189_v32  ;;  %v2159_v33 = vmul.f32 0.2, %v2105_v1  ;;  %v4900_v39 = vld [vmem:[#allocation19_spill] sm:$0xff] }
 0x313   :  { %v3075_v16 = vpop.f32.mrf.mxu1  ;;  %v1968_v32 = vadd.f32 %v4900_v39, %v4899_v48 }
 0x314   :  { %v2108_v12 = vadd.f32 %v3074_v18, %v1947_v4  ;;  %v2191_v29 = vmax.f32 %v2105_v1, %v2159_v33  ;;  %v4902_v33 = vld [vmem:[#allocation14_spill] sm:$0xff] }
 0x315   :  { %v3076_v28 = vpop.f32.mrf.mxu1 }
 0x316   :  { %v2160_v7 = vmul.f32 0.2, %v2108_v12  ;;  %v3077_v31 = vadd.f32 %v3076_v28, %v3075_v16  ;;  %v4901_v16 = vld [vmem:[#allocation26_spill] sm:$0xff] }
 0x317   :  { %v3078_v14 = vpop.f32.mrf.mxu1 }
 0x318   :  { %v2192_v45 = vmax.f32 %v2108_v12, %v2160_v7  ;;  %v2113_v3 = vadd.f32 %v3077_v31, %v1952_v40  ;;  %v1971_v12 = vadd.f32 %v4902_v33, %v4901_v16 }
 0x319   :  { %v3079_v20 = vpop.f32.mrf.mxu1 }
 0x31a   :  { %v3080_v62 = vadd.f32 %v3079_v20, %v3078_v14  ;;  %v2227_v46 = vpack.c.bf16 %v2192_v45, %v2191_v29  ;;  %v2161_v37 = vmul.f32 0.2, %v2113_v3  ;;  %v3396_v45 = vld [vmem:[%s4801_s5 + $0x60] ss:$8 sps:$4 sm:$0xff]   ;;  %v3399_v20 = vld [vmem:[%s4801_s5 + $0x70] ss:$8 sps:$4 sm:$0xff]  }
 0x31b   :  { %v3081_v60 = vpop.f32.mrf.mxu1 }
 0x31c   :  { %v2116_v22 = vadd.f32 %v3080_v62, %v1955_v50  ;;  %v2193_v51 = vmax.f32 %v2113_v3, %v2161_v37  ;;  %v3397_v3 = vld [vmem:[%s4801_s5 + $0x74] ss:$8 sps:$4 sm:$0xff]   ;;  %v2260_v50 = vpop.permute.xlu0 %2259  ;;  %v2265_v62 = vpop.permute.xlu1 %2264 }
 0x31d   :  { %v3082_v55 = vpop.f32.mrf.mxu1 }
 0x31e   :  { %v2162_v23 = vmul.f32 0.2, %v2116_v22  ;;  %v3083_v19 = vadd.f32 %v3082_v55, %v3081_v60 }
 0x31f   :  { %v3084_v8 = vpop.f32.mrf.mxu1 }
 0x320   :  { %v2194_v44 = vmax.f32 %v2116_v22, %v2162_v23  ;;  %v2121_v5 = vadd.f32 %v3083_v19, %v1960_v17  ;;  %v2275_v60 = vpop.permute.xlu1 %2274 }
 0x321   :  { %v3085_v35 = vpop.f32.mrf.mxu1 }
 0x322   :  { %v3086_v11 = vadd.f32 %v3085_v35, %v3084_v8  ;;  %v2228_v41 = vpack.c.bf16 %v2194_v44, %v2193_v51  ;;  %v2163_v53 = vmul.f32 0.2, %v2121_v5 }
 0x323   :  { %v3087_v42 = vpop.f32.mrf.mxu1 }
 0x324   :  { %v2124_v27 = vadd.f32 %v3086_v11, %v1963_v10  ;;  %v2195_v59 = vmax.f32 %v2121_v5, %v2163_v53  ;;  %v2560_v22 = vpop.permute.xlu1 %2559 }
 0x325   :  { %v3088_v47 = vpop.f32.mrf.mxu1 }
 0x326   :  { %v2164_v15 = vmul.f32 0.2, %v2124_v27  ;;  %v3089_v1 = vadd.f32 %v3088_v47, %v3087_v42 }
 0x327   :  { %v3090_v58 = vpop.f32.mrf.mxu1 }
 0x328   :  { %v2196_v2 = vmax.f32 %v2124_v27, %v2164_v15  ;;  %v2129_v4 = vadd.f32 %v3089_v1, %v1968_v32  ;;  %v2280_v17 = vpop.permute.xlu1 %2279 }
 0x329   :  { %v3091_v18 = vpop.f32.mrf.mxu1 }
 0x32a   :  { %v3092_v28 = vadd.f32 %v3091_v18, %v3090_v58  ;;  %v2229_v61 = vpack.c.bf16 %v2196_v2, %v2195_v59  ;;  %v2165_v24 = vmul.f32 0.2, %v2129_v4 }
 0x32c   :  { %v2132_v40 = vadd.f32 %v3092_v28, %v1971_v12  ;;  %v2197_v31 = vmax.f32 %v2129_v4, %v2165_v24  ;;  %v2285_v44 = vpop.permute.xlu1 %2284 }
 0x32e   :  { %v2166_v7 = vmul.f32 0.2, %v2132_v40 }
 0x330   :  { %v2198_v14 = vmax.f32 %v2132_v40, %v2166_v7  ;;  %v2290_v10 = vpop.permute.xlu1 %2289 }
 0x332   :  { %v2230_v29 = vpack.c.bf16 %v2198_v14, %v2197_v31 }
 0x334   :  { %3093 = vmatprep.subr.bf16.mxu0 %v2230_v29  ;;  %v2295_v27 = vpop.permute.xlu1 %2294 }
 0x335   :  { %3094 = vmatpush3.bf16.msra.mxu0 %v4674_v25  ;;  %v3388_v25 = vld [vmem:[%s4801_s5 + $0x44] ss:$8 sps:$4 sm:$0xff]  }
 0x336   :  { %3095 = vmatprep.subr.bf16.mxu0 %v2229_v61 }
 0x338   :  { %v2300_v59 = vpop.permute.xlu1 %2299 }
 0x339   :  { %3096 = vmatpush3.bf16.msra.mxu0 %v4668_v52  ;;  %v3387_v52 = vld [vmem:[%s4801_s5 + $0x30] ss:$8 sps:$4 sm:$0xff]  }
 0x33a   :  { %3097 = vmatprep.subr.bf16.mxu0 %v2228_v41 }
 0x33c   :  { %v2305_v29 = vpop.permute.xlu1 %2304 }
 0x33d   :  { %3098 = vmatpush3.bf16.msra.mxu0 %v4662_v34  ;;  %v3376_v34 = vld [vmem:[%s4801_s5] ss:$8 sps:$4 sm:$0xff]  }
 0x33e   :  { %3099 = vmatprep.subr.bf16.mxu0 %v2227_v46  ;;  %v2270_v46 = vpop.permute.xlu0 %2269 }
 0x341   :  { %3100 = vmatpush3.bf16.msra.mxu0 %v4656_v57  ;;  %v3385_v57 = vld [vmem:[%s4801_s5 + $0x34] ss:$8 sps:$4 sm:$0xff]  }
 0x342   :  { %3101 = vmatprep.subr.bf16.mxu0 %v2226_v13  ;;  %v3394_v13 = vld [vmem:[%s4801_s5 + $0x64] ss:$8 sps:$4 sm:$0xff]   ;;  %v4766_v37 = vpop.permute.xlu0 %2554 }
 0x345   :  { %3102 = vmatpush3.bf16.msra.mxu0 %v4647_v38  ;;  %v3379_v38 = vld [vmem:[%s4801_s5 + $0x14] ss:$8 sps:$4 sm:$0xff]  }
 0x346   :  { %3103 = vmatprep.subr.bf16.mxu0 %v4692_v36  ;;  %v3393_v36 = vld [vmem:[%s4801_s5 + $0x50] ss:$8 sps:$4 sm:$0xff]   ;;  %v4768_v55 = vpop.permute.xlu0 %2564 }
 0x349   :  { %3104 = vmatpush3.bf16.msra.mxu0 %v4641_v0  ;;  %v3381_v0 = vld [vmem:[%s4801_s5 + $0x10] ss:$8 sps:$4 sm:$0xff]  }
 0x34a   :  { %3105 = vmatprep.subr.bf16.mxu0 %v4686_v54  ;;  %v3391_v54 = vld [vmem:[%s4801_s5 + $0x54] ss:$8 sps:$4 sm:$0xff]   ;;  %v4770_v19 = vpop.permute.xlu0 %2569 }
 0x34d   :  { %3106 = vmatpush3.bf16.msra.mxu0 %v4635_v63  ;;  %v3382_v63 = vld [vmem:[%s4801_s5 + $0x24] ss:$8 sps:$4 sm:$0xff]  }
 0x34e   :  { %3107 = vmatprep.subr.bf16.mxu0 %v4680_v43  ;;  %v3390_v43 = vld [vmem:[%s4801_s5 + $0x40] ss:$8 sps:$4 sm:$0xff]   ;;  %v4772_v35 = vpop.permute.xlu0 %2574 }
 0x351   :  { %3108 = vmatpush3.bf16.msra.mxu0 %v4631_v9  ;;  %v3384_v9 = vld [vmem:[%s4801_s5 + $0x20] ss:$8 sps:$4 sm:$0xff]  }
 0x352   :  { %v4774_v41 = vpop.permute.xlu0 %2579 }
 0x354   :  { %2440 = vmatmul.mubr.bf16.vlgmr.msra.gmra.mxu0 %v3376_v34 }
 0x355   :  { %2447 = vmatprep.mubr.bf16.mxu0 %v3379_v38 }
 0x356   :  { %v4776_v48 = vpop.permute.xlu0 %2584 }
 0x35a   :  { %v4778_v33 = vpop.permute.xlu0 %2589 }
 0x35c   :  { %2448 = vmatmul.mubr.bf16.gmra.mxu0 %v3381_v0 }
 0x35d   :  { %2455 = vmatprep.mubr.bf16.mxu0 %v3382_v63 }
 0x364   :  { %2456 = vmatmul.mubr.bf16.gmra.mxu0 %v3384_v9  ;;  %v4780_v9 = vpop.permute.xlu0 %2594 }
 0x365   :  { %2463 = vmatprep.mubr.bf16.mxu0 %v3385_v57 }
 0x36c   :  { %2464 = vmatmul.mubr.bf16.gmra.mxu0 %v3387_v52 }
 0x36d   :  { %2471 = vmatprep.mubr.bf16.mxu0 %v3388_v25 }
 0x374   :  { %2472 = vmatmul.mubr.bf16.gmra.mxu0 %v3390_v43 }
 0x375   :  { %2479 = vmatprep.mubr.bf16.mxu0 %v3391_v54 }
 0x37c   :  { %2480 = vmatmul.mubr.bf16.gmra.mxu0 %v3393_v36 }
 0x37d   :  { %2487 = vmatprep.mubr.bf16.mxu0 %v3394_v13 }
 0x384   :  { %2488 = vmatmul.mubr.bf16.gmra.mxu0 %v3396_v45 }
 0x385   :  { %2495 = vmatprep.mubr.bf16.mxu0 %v3397_v3 }
 0x38c   :  { %2496 = vmatmul.mubr.bf16.gmra.mxu0 %v3399_v20 }
 0x414   :  { %v3109_v56 = vpop.f32.mrf.mxu0 }
 0x416   :  { %v3110_v6 = vpop.f32.mrf.mxu0 }
 0x417   :  { %v3111_v15 = vadd.f32 %v3110_v6, %v3109_v56 }
 0x418   :  { %v3112_v23 = vpop.f32.mrf.mxu0 }
 0x419   :  { %v2442_v16 = vadd.f32 %v3111_v15, %v2250_v49 }
 0x41a   :  { %v3113_v8 = vpop.f32.mrf.mxu0 }
 0x41b   :  { %v3114_v39 = vadd.f32 %v3113_v8, %v3112_v23  ;;  %v2504_v14 = vmul.f32 0.2, %v2442_v16 }
 0x41c   :  { %v3115_v51 = vpop.f32.mrf.mxu0 }
 0x41d   :  { %v2445_v2 = vadd.f32 %v3114_v39, %v2255_v21  ;;  %v2520_v36 = vmax.f32 %v2442_v16, %v2504_v14  ;;  %v2310_v21 = vpop.permute.xlu1 %2309 }
 0x41e   :  { %v3116_v5 = vpop.f32.mrf.mxu0 }
 0x41f   :  { %v3117_v1 = vadd.f32 %v3116_v5, %v3115_v51  ;;  %v2505_v24 = vmul.f32 0.2, %v2445_v2  ;;  %v2632_v23 = vmul.f32 %v4766_v37, %v2520_v36  ;;  %v2600_v51 = vpop.permute.xlu0 %2599 }
 0x420   :  { %v3118_v30 = vpop.f32.mrf.mxu0 }
 0x421   :  { %v2450_v12 = vadd.f32 %v3117_v1, %v2260_v50  ;;  %v2521_v57 = vmax.f32 %v2445_v2, %v2505_v24 }
 0x422   :  { %v3119_v26 = vpop.f32.mrf.mxu0 }
 0x423   :  { %v3120_v4 = vadd.f32 %v3119_v26, %v3118_v30  ;;  %v2506_v34 = vmul.f32 0.2, %v2450_v12  ;;  %v2633_v50 = vmul.f32 %v2560_v22, %v2521_v57 }
 0x424   :  { %v3121_v11 = vpop.f32.mrf.mxu0 }
 0x425   :  { %v2453_v40 = vadd.f32 %v3120_v4, %v2265_v62  ;;  %v2522_v13 = vmax.f32 %v2450_v12, %v2506_v34 }
 0x426   :  { %v3122_v42 = vpop.f32.mrf.mxu0 }
 0x427   :  { %v3123_v28 = vadd.f32 %v3122_v42, %v3121_v11  ;;  %v2507_v52 = vmul.f32 0.2, %v2453_v40 }
 0x428   :  { %v3124_v53 = vpop.f32.mrf.mxu0 }
 0x429   :  { %v2458_v38 = vadd.f32 %v3123_v28, %v2270_v46  ;;  %v2523_v62 = vmax.f32 %v2453_v40, %v2507_v52 }
 0x42a   :  { %v3125_v47 = vpop.f32.mrf.mxu0 }
 0x42b   :  { %v3126_v7 = vadd.f32 %v3125_v47, %v3124_v53  ;;  %v2508_v45 = vmul.f32 0.2, %v2458_v38  ;;  %v2635_v53 = vmul.f32 %v4770_v19, %v2523_v62 }
 0x42c   :  { %v3127_v32 = vpop.f32.mrf.mxu0 }
 0x42d   :  { %v2461_v25 = vadd.f32 %v3126_v7, %v2275_v60  ;;  %v2634_v60 = vmul.f32 %v4768_v55, %v2522_v13  ;;  %v2524_v5 = vmax.f32 %v2458_v38, %v2508_v45 }
 0x42e   :  { %v3128_v58 = vpop.f32.mrf.mxu0 }
 0x42f   :  { %v3129_v0 = vadd.f32 %v3128_v58, %v3127_v32  ;;  %v2509_v56 = vmul.f32 0.2, %v2461_v25  ;;  %v2636_v37 = vmul.f32 %v4772_v35, %v2524_v5 }
 0x430   :  { %v3130_v18 = vpop.f32.mrf.mxu0 }
 0x431   :  { %v2466_v3 = vadd.f32 %v3129_v0, %v2280_v17  ;;  %v2648_v17 = vadd.f32 %v2633_v50, %v2632_v23  ;;  %v2525_v47 = vmax.f32 %v2461_v25, %v2509_v56 }
 0x432   :  { %v3131_v61 = vpop.f32.mrf.mxu0 }
 0x433   :  { %v3132_v43 = vadd.f32 %v3131_v61, %v3130_v18  ;;  %v2510_v30 = vmul.f32 0.2, %v2466_v3  ;;  %v2649_v15 = vadd.f32 %v2648_v17, %v2634_v60  ;;  %v2605_v18 = vpop.permute.xlu0 %2604  ;;  %v2637_v16 = vmul.f32 %v4774_v41, %v2525_v47 }
 0x434   :  { %v3133_v31 = vpop.f32.mrf.mxu0 }
 0x435   :  { %v2469_v46 = vadd.f32 %v3132_v43, %v2285_v44  ;;  %v2315_v44 = vpop.permute.xlu1 %2314  ;;  %v2526_v1 = vmax.f32 %v2466_v3, %v2510_v30 }
 0x436   :  { %v3134_v63 = vpop.f32.mrf.mxu0 }
 0x437   :  { %v3135_v20 = vadd.f32 %v3134_v63, %v3133_v31  ;;  %v2511_v22 = vmul.f32 0.2, %v2469_v46  ;;  %v2610_v41 = vpop.permute.xlu0 %2609 }
 0x438   :  { %v3136_v54 = vpop.f32.mrf.mxu0 }
 0x439   :  { %v2474_v26 = vadd.f32 %v3135_v20, %v2290_v10  ;;  %v2650_v10 = vadd.f32 %v2649_v15, %v2635_v53  ;;  %v2527_v12 = vmax.f32 %v2469_v46, %v2511_v22  ;;  %v2320_v14 = vpop.permute.xlu1 %2319 }
 0x43a   :  { %v3137_v49 = vpop.f32.mrf.mxu0 }
 0x43b   :  { %v3138_v8 = vadd.f32 %v3137_v49, %v3136_v54  ;;  %v2512_v58 = vmul.f32 0.2, %v2474_v26  ;;  %v2651_v24 = vadd.f32 %v2650_v10, %v2636_v37 }
 0x43c   :  { %v3139_v6 = vpop.f32.mrf.mxu0 }
 0x43d   :  { %v2477_v32 = vadd.f32 %v3138_v8, %v2295_v27  ;;  %v2638_v27 = vmul.f32 %v4776_v48, %v2526_v1  ;;  %v2528_v40 = vmax.f32 %v2474_v26, %v2512_v58  ;;  %v2652_v34 = vadd.f32 %v2651_v24, %v2637_v16  ;;  %v2325_v49 = vpop.permute.xlu1 %2324 }
 0x43e   :  { %v3140_v11 = vpop.f32.mrf.mxu0 }
 0x43f   :  { %v3141_v42 = vadd.f32 %v3140_v11, %v3139_v6  ;;  %v2513_v19 = vmul.f32 0.2, %v2477_v32  ;;  %v2653_v52 = vadd.f32 %v2652_v34, %v2638_v27  ;;  %v2640_v25 = vmul.f32 %v4780_v9, %v2528_v40  ;;  %v2615_v6 = vpop.permute.xlu0 %2614 }
 0x440   :  { %v3142_v39 = vpop.f32.mrf.mxu0 }
 0x441   :  { %v2482_v55 = vadd.f32 %v3141_v42, %v2300_v59  ;;  %v2639_v59 = vmul.f32 %v4778_v33, %v2527_v12  ;;  %v2529_v0 = vmax.f32 %v2477_v32, %v2513_v19  ;;  %v2620_v17 = vpop.permute.xlu1 %2619 }
 0x442   :  { %v3143_v2 = vpop.f32.mrf.mxu0 }
 0x443   :  { %v3144_v4 = vadd.f32 %v3143_v2, %v3142_v39  ;;  %v2514_v31 = vmul.f32 0.2, %v2482_v55  ;;  %v2654_v36 = vadd.f32 %v2653_v52, %v2639_v59  ;;  %v2641_v45 = vmul.f32 %v2600_v51, %v2529_v0  ;;  %v2625_v32 = vpop.permute.xlu0 %2624 }
 0x444   :  { %v3145_v28 = vpop.f32.mrf.mxu0 }
 0x445   :  { %v2485_v61 = vadd.f32 %v3144_v4, %v2305_v29  ;;  %v2530_v43 = vmax.f32 %v2482_v55, %v2514_v31  ;;  %v2655_v50 = vadd.f32 %v2654_v36, %v2640_v25  ;;  %v2630_v2 = vpop.permute.xlu1 %2629 }
 0x446   :  { %v3146_v7 = vpop.f32.mrf.mxu0 }
 0x447   :  { %v3147_v35 = vadd.f32 %v3146_v7, %v3145_v28  ;;  %v2515_v63 = vmul.f32 0.2, %v2485_v61  ;;  %v2642_v62 = vmul.f32 %v2605_v18, %v2530_v43  ;;  %v2656_v8 = vadd.f32 %v2655_v50, %v2641_v45  ;;  %v2673_v27 = vpop.permute.xlu0 %2672 }
 0x448   :  { %v3148_v38 = vpop.f32.mrf.mxu0  ;;  %v2675_v18 = vlaneseq }
 0x449   :  { %v2490_v57 = vadd.f32 %v3147_v35, %v2310_v21  ;;  %v2531_v3 = vmax.f32 %v2485_v61, %v2515_v63  ;;  %v2657_v26 = vadd.f32 %v2656_v8, %v2642_v62 }
 0x44a   :  { %v3149_v29 = vpop.f32.mrf.mxu0  ;;  %v2676_v12 = vshrl.u32 %v2675_v18, 7 }
 0x44b   :  { %v2516_v54 = vmul.f32 0.2, %v2490_v57  ;;  %v3150_v48 = vadd.f32 %v3149_v29, %v3148_v38  ;;  %v2643_v9 = vmul.f32 %v2610_v41, %v2531_v3 }
 0x44c   :  { %v3151_v13 = vpop.f32.mrf.mxu0  ;;  %v2677_v61 = vsub.s32 0, %v2676_v12 }
 0x44d   :  { %v2493_v20 = vadd.f32 %v3150_v48, %v2315_v44  ;;  %v2532_v56 = vmax.f32 %v2490_v57, %v2516_v54  ;;  %v2658_v53 = vadd.f32 %v2657_v26, %v2643_v9 }
 0x44e   :  { %v3152_v33 = vpop.f32.mrf.mxu0  ;;  %v2678_v7 = vrot.slane %v2673_v27, %v2677_v61 }
 0x44f   :  { %v2517_v46 = vmul.f32 0.2, %v2493_v20  ;;  %v3153_v21 = vadd.f32 %v3152_v33, %v3151_v13  ;;  %v2644_v11 = vmul.f32 %v2615_v6, %v2532_v56 }
 0x450   :  { %v3154_v23 = vpop.f32.mrf.mxu0 }
 0x451   :  { %v2533_v60 = vmax.f32 %v2493_v20, %v2517_v46  ;;  %v2498_v5 = vadd.f32 %v3153_v21, %v2320_v14  ;;  %v2659_v44 = vadd.f32 %v2658_v53, %v2644_v11 }
 0x452   :  { %v3155_v30 = vpop.f32.mrf.mxu0 }
 0x453   :  { %v2518_v42 = vmul.f32 0.2, %v2498_v5  ;;  %v3156_v51 = vadd.f32 %v3155_v30, %v3154_v23  ;;  %v2645_v47 = vmul.f32 %v2620_v17, %v2533_v60 }
 0x455   :  { %v2534_v22 = vmax.f32 %v2498_v5, %v2518_v42  ;;  %v2501_v39 = vadd.f32 %v3156_v51, %v2325_v49  ;;  %v2660_v1 = vadd.f32 %v2659_v44, %v2645_v47 }
 0x457   :  { %v2646_v15 = vmul.f32 %v2625_v32, %v2534_v22  ;;  %v2519_v37 = vmul.f32 0.2, %v2501_v39 }
 0x459   :  { %v2535_v58 = vmax.f32 %v2501_v39, %v2519_v37  ;;  %v2661_v55 = vadd.f32 %v2660_v1, %v2646_v15 }
 0x45b   :  { %v2647_v4 = vmul.f32 %v2630_v2, %v2535_v58 }
 0x45d   :  { %v2662_v10 = vadd.f32 %v2661_v55, %v2647_v4 }
 0x45f   :  { %v2663_v16 = vrot.slane %v2662_v10, 4 }
 0x461   :  { %v2664_v28 = vadd.f32 %v2663_v16, %v2662_v10 }
 0x463   :  { %v2665_v19 = vrot.slane %v2664_v28, 2 }
 0x465   :  { %v2666_v24 = vadd.f32 %v2665_v19, %v2664_v28 }
 0x467   :  { %v2667_v40 = vrot.slane %v2666_v24, 1 }
 0x469   :  { %v2668_v31 = vadd.f32 %v2667_v40, %v2666_v24 }
 0x46b   :  { %v2679_v35 = vadd.f32 %v2678_v7, %v2668_v31 }
 0x46d   :  { %2680 = vst [vmem:[%s4802_s9] sm:$0x1] %v2679_v35 }

</bundles_post_ra>
